<compile_context>
chip_gen: v7x
topology: tpu7x:2x2x1
jax: 0.10.0
libtpu: 0.0.40
codegen_flags: <defaults>
</compile_context>

<pallas_src>
import functools

import jax
import jax.numpy as jnp
import numpy as np
from jax.experimental import pallas as pl
from jax.experimental.pallas import tpu as pltpu

EPS = 1e-5      # nn.BatchNorm1d default
LANE = 128      # TPU lane width: channel padding target
HALO = 8        # global zero margin rows on the shared conv-input buffers
PADL = 4        # per-sample zero rows before the data  (>= max left  pad = 3)
PADR = 4        # per-sample zero rows after  the data  (>= max right pad = 4)


def _round_up(v, m):
    return (v + m - 1) // m * m


# ----------------------------------- kernel ----------------------------------

def resnet_block_kernel(x_ref, m_ref,
                        w1_ref, g1_ref, be1_ref,
                        w2_ref, g2_ref, be2_ref,
                        w3_ref, g3_ref, be3_ref,
                        wr_ref, gr_ref, ber_ref,
                        out_ref, pbuf_ref, *, inv_count):
    """Row space = N segments of S rows (4 zero rows | L data rows | 4 zero rows)."""
    T = out_ref.shape[0]          # N * S   (flat row count)
    C = out_ref.shape[1]          # padded out-channels (multiple of 128)
    m = m_ref[...]                # (T, 1) valid-row mask (1 = real (n, l) position)

    def conv(src_ref, w_ref, ksize, left):
        """TF-style SAME conv: one lane-dense bf16 MXU matmul per tap."""
        s0 = HALO - left
        acc = jnp.dot(src_ref[s0:s0 + T, :].astype(jnp.bfloat16), w_ref[0],
                      preferred_element_type=jnp.float32)
        for j in range(1, ksize):                                # static tap loop
            s = s0 + j
            acc = acc + jnp.dot(src_ref[s:s + T, :].astype(jnp.bfloat16), w_ref[j],
                                preferred_element_type=jnp.float32)
        return acc

    def bn(y, g_ref, b_ref, relu):
        """Training-mode BatchNorm1d (biased batch stats) folded to one FMA."""
        ym = y * m                                               # drop halo rows
        s = jnp.sum(ym, axis=0, keepdims=True)                   # (1, C)
        ss = jnp.sum(ym * ym, axis=0, keepdims=True)             # (1, C)
        mean = s * inv_count
        var = ss * inv_count - mean * mean
        a = g_ref[...] * jax.lax.rsqrt(var + EPS)
        c = b_ref[...] - mean * a
        z = y * a + c
        if relu:
            z = jnp.maximum(z, 0.0)
        return z

    # zero the global halo margins of the intermediate buffer once (aligned stores)
    pbuf_ref[0:HALO, :] = jnp.zeros((HALO, C), pbuf_ref.dtype)
    pbuf_ref[HALO + T:HALO + T + HALO, :] = jnp.zeros((HALO, C), pbuf_ref.dtype)

    # ---- main path: conv(k=8) -> BN -> ReLU  (conv bias cancels in train-BN) ----
    h = bn(conv(x_ref, w1_ref, 8, 3), g1_ref, be1_ref, relu=True) * m
    pbuf_ref[HALO:HALO + T, :] = h

    # ---- conv(k=5) -> BN -> ReLU ----
    h = bn(conv(pbuf_ref, w2_ref, 5, 2), g2_ref, be2_ref, relu=True) * m
    pbuf_ref[HALO:HALO + T, :] = h

    # ---- conv(k=3) -> BN -> ReLU ----
    h = bn(conv(pbuf_ref, w3_ref, 3, 1), g3_ref, be3_ref, relu=True)

    # ---- residual path: 1x1 conv -> BN ----
    r = jnp.dot(x_ref[HALO:HALO + T, :].astype(jnp.bfloat16), wr_ref[...],
                preferred_element_type=jnp.float32)
    r = bn(r, gr_ref, ber_ref, relu=False)

    out_ref[...] = (h + r).astype(out_ref.dtype)


# ----------------------------------- wrapper ---------------------------------

def resnet_block_forward(x_ncl, params):
    """x_ncl: (N, Cin, L) float32 (PyTorch NCL layout). Returns (N, Cout, L) f32."""
    N, Cin, L = x_ncl.shape
    Cout = params["w1"].shape[0]              # torch conv weight layout (O, I, K)
    Cip = _round_up(Cin, LANE)
    Cop = _round_up(Cout, LANE)
    S = L + PADL + PADR                       # per-sample segment length
    T = N * S                                 # flat row space

    # NCL -> NLC, per-sample SAME halo, fold batch into rows, global halo, channel pad.
    x_nlc = jnp.transpose(x_ncl, (0, 2, 1)).astype(jnp.float32)
    x_rows = jnp.pad(x_nlc, ((0, 0), (PADL, PADR), (0, Cip - Cin))).reshape(T, Cip)
    x_flat = jnp.pad(x_rows, ((HALO, HALO), (0, 0)))

    # valid-row mask: 1 at real (n, l) positions, 0 at per-sample halo rows
    mask = jnp.pad(jnp.ones((N, L, 1), jnp.float32),
                   ((0, 0), (PADL, PADR), (0, 0))).reshape(T, 1)

    def prep_w(w, cin_pad):                   # (O, I, K) -> (K, I_pad, O_pad) bf16
        O, I, _ = w.shape
        wk = jnp.transpose(jnp.asarray(w, jnp.float32), (2, 1, 0))
        wk = jnp.pad(wk, ((0, 0), (0, cin_pad - I), (0, Cop - O)))
        return wk.astype(jnp.bfloat16)

    def prep_v(v):                            # (C,) -> (1, C_pad) f32
        v = jnp.asarray(v, jnp.float32)
        return jnp.pad(v, (0, Cop - v.shape[0])).reshape(1, Cop)

    ins = [
        x_flat, mask,
        prep_w(params["w1"], Cip), prep_v(params["g1"]), prep_v(params["beta1"]),
        prep_w(params["w2"], Cop), prep_v(params["g2"]), prep_v(params["beta2"]),
        prep_w(params["w3"], Cop), prep_v(params["g3"]), prep_v(params["beta3"]),
        prep_w(params["wr"], Cip)[0], prep_v(params["gr"]), prep_v(params["betar"]),
    ]
    # NOTE: conv biases b1/b2/b3/br are intentionally not passed to the kernel --
    # they cancel exactly through the training-mode BatchNorm mean subtraction.

    vmem = pl.BlockSpec(memory_space=pltpu.MemorySpace.VMEM)
    kernel = functools.partial(resnet_block_kernel, inv_count=1.0 / (N * L))
    out_flat = pl.pallas_call(
        kernel,
        out_shape=jax.ShapeDtypeStruct((T, Cop), jnp.float32),
        in_specs=[vmem] * len(ins),
        out_specs=vmem,
        scratch_shapes=[pltpu.VMEM((T + 2 * HALO, Cop), jnp.float32)],
    )(*ins)

    out = out_flat.reshape(N, S, Cop)[:, PADL:PADL + L, :Cout]
    return jnp.transpose(out, (0, 2, 1))                 # back to (N, Cout, L)


# ----------------------------- pure-JAX reference ----------------------------
# Exact PyTorch ResNetBlock semantics (conv biases included, train-mode BN).

def _ref_conv_same(x, w, b):
    K = w.shape[2]
    left = (K - 1) // 2
    right = (K - 1) - left
    y = jax.lax.conv_general_dilated(
        x, w, window_strides=(1,), padding=[(left, right)],
        dimension_numbers=("NCH", "OIH", "NCH"))
    return y + b[None, :, None]


def _ref_bn(x, g, beta):
    mean = jnp.mean(x, axis=(0, 2), keepdims=True)
    var = jnp.mean((x - mean) ** 2, axis=(0, 2), keepdims=True)
    return (x - mean) / jnp.sqrt(var + EPS) * g[None, :, None] + beta[None, :, None]


def ref_forward(x, p):
    h = jnp.maximum(_ref_bn(_ref_conv_same(x, p["w1"], p["b1"]), p["g1"], p["beta1"]), 0.0)
    h = jnp.maximum(_ref_bn(_ref_conv_same(h, p["w2"], p["b2"]), p["g2"], p["beta2"]), 0.0)
    h = jnp.maximum(_ref_bn(_ref_conv_same(h, p["w3"], p["b3"]), p["g3"], p["beta3"]), 0.0)
    res = _ref_bn(_ref_conv_same(x, p["wr"], p["br"]), p["gr"], p["betar"])
    return h + res


# ------------------------------------ main -----------------------------------

if __name__ == "__main__":
    N, Cin, Cout, L = 2, 4, 8, 16      # in_channels != out_channels -> residual active
    key = jax.random.PRNGKey(0)
    ks = jax.random.split(key, 17)

    def w_init(k, shape):
        return (0.1 * jax.random.normal(k, shape)).astype(jnp.float32)

    params = {
        # layer 1: kernel 8
        "w1": w_init(ks[0], (Cout, Cin, 8)),
        "b1": w_init(ks[1], (Cout,)),
        "g1": (1.0 + 0.1 * jax.random.normal(ks[2], (Cout,))).astype(jnp.float32),
        "beta1": w_init(ks[3], (Cout,)),
        # layer 2: kernel 5
        "w2": w_init(ks[4], (Cout, Cout, 5)),
        "b2": w_init(ks[5], (Cout,)),
        "g2": (1.0 + 0.1 * jax.random.normal(ks[6], (Cout,))).astype(jnp.float32),
        "beta2": w_init(ks[7], (Cout,)),
        # layer 3: kernel 3
        "w3": w_init(ks[8], (Cout, Cout, 3)),
        "b3": w_init(ks[9], (Cout,)),
        "g3": (1.0 + 0.1 * jax.random.normal(ks[10], (Cout,))).astype(jnp.float32),
        "beta3": w_init(ks[11], (Cout,)),
        # residual: 1x1 conv + BN
        "wr": w_init(ks[12], (Cout, Cin, 1)),
        "br": w_init(ks[13], (Cout,)),
        "gr": (1.0 + 0.1 * jax.random.normal(ks[14], (Cout,))).astype(jnp.float32),
        "betar": w_init(ks[15], (Cout,)),
    }

    x = jax.random.normal(ks[16], (N, Cin, L)).astype(jnp.float32)

    out = jax.block_until_ready(jax.jit(resnet_block_forward)(x, params))
    ref = jax.block_until_ready(ref_forward(x, params))

    # tolerance accounts for the intentional bf16 quantization of MXU operands
    np.testing.assert_allclose(np.asarray(out), np.asarray(ref), rtol=5e-2, atol=5e-2)
    assert out.shape == (N, Cout, L)
    print("KERNEL_OK")
</pallas_src>

<mosaic_0001>
module attributes {stable_mosaic.version = 11 : i64} {
  func.func @resnet_block_kernel(%arg0: memref<64x128xf32, #tpu.memory_space<vmem>>, %arg1: memref<48x1xf32, #tpu.memory_space<vmem>>, %arg2: memref<8x128x128xbf16, #tpu.memory_space<vmem>>, %arg3: memref<1x128xf32, #tpu.memory_space<vmem>>, %arg4: memref<1x128xf32, #tpu.memory_space<vmem>>, %arg5: memref<5x128x128xbf16, #tpu.memory_space<vmem>>, %arg6: memref<1x128xf32, #tpu.memory_space<vmem>>, %arg7: memref<1x128xf32, #tpu.memory_space<vmem>>, %arg8: memref<3x128x128xbf16, #tpu.memory_space<vmem>>, %arg9: memref<1x128xf32, #tpu.memory_space<vmem>>, %arg10: memref<1x128xf32, #tpu.memory_space<vmem>>, %arg11: memref<128x128xbf16, #tpu.memory_space<vmem>>, %arg12: memref<1x128xf32, #tpu.memory_space<vmem>>, %arg13: memref<1x128xf32, #tpu.memory_space<vmem>>, %arg14: memref<48x128xf32, #tpu.memory_space<vmem>>, %arg15: memref<64x128xf32, #tpu.memory_space<vmem>>) attributes {dimension_semantics = [], scalar_prefetch = 0 : i64, scratch_operands = 1 : i64, tpu.core_type = #tpu.core_type<tc>} {
    %c0 = arith.constant 0 : index
    %c0_0 = arith.constant 0 : index
    %0 = vector.load %arg1[%c0, %c0_0] : memref<48x1xf32, #tpu.memory_space<vmem>>, vector<48x1xf32>
    %cst = arith.constant 0.000000e+00 : f32
    %1 = vector.broadcast %cst : f32 to vector<8x128xf32>
    %c0_1 = arith.constant 0 : index
    %c0_2 = arith.constant 0 : index
    %2 = vector.load %arg15[%c0_1, %c0_2] : memref<64x128xf32, #tpu.memory_space<vmem>>, vector<8x128xf32>
    tpu.vector_store %arg15[%c0_1, %c0_2], %1 {strides = array<i32>} : memref<64x128xf32, #tpu.memory_space<vmem>>, vector<8x128xf32>,
    %cst_3 = arith.constant 0.000000e+00 : f32
    %3 = vector.broadcast %cst_3 : f32 to vector<8x128xf32>
    %c56 = arith.constant 56 : index
    %c0_4 = arith.constant 0 : index
    %4 = vector.load %arg15[%c56, %c0_4] : memref<64x128xf32, #tpu.memory_space<vmem>>, vector<8x128xf32>
    tpu.vector_store %arg15[%c56, %c0_4], %3 {strides = array<i32>} : memref<64x128xf32, #tpu.memory_space<vmem>>, vector<8x128xf32>,
    %c5 = arith.constant 5 : index
    %c0_5 = arith.constant 0 : index
    %5 = vector.load %arg0[%c5, %c0_5] : memref<64x128xf32, #tpu.memory_space<vmem>>, vector<48x128xf32>
    %6 = arith.truncf %5 : vector<48x128xf32> to vector<48x128xbf16>
    %c0_6 = arith.constant 0 : index
    %c0_7 = arith.constant 0 : index
    %c0_8 = arith.constant 0 : index
    %7 = vector.load %arg2[%c0_6, %c0_7, %c0_8] : memref<8x128x128xbf16, #tpu.memory_space<vmem>>, vector<1x128x128xbf16>
    %8 = vector.shape_cast %7 : vector<1x128x128xbf16> to vector<128x128xbf16>
    %cst_9 = arith.constant dense<0.000000e+00> : vector<48x128xf32>
    %9 = tpu.matmul %6, %8, %cst_9 {dimension_numbers = #tpu.dot_dimension_numbers<[1], [0], [0], [1], [0, 0, 1, 1], [], []>} : vector<48x128xbf16>, vector<128x128xbf16>, vector<48x128xf32> -> vector<48x128xf32>
    %c6 = arith.constant 6 : index
    %c0_10 = arith.constant 0 : index
    %10 = vector.load %arg0[%c6, %c0_10] : memref<64x128xf32, #tpu.memory_space<vmem>>, vector<48x128xf32>
    %11 = arith.truncf %10 : vector<48x128xf32> to vector<48x128xbf16>
    %c1 = arith.constant 1 : index
    %c0_11 = arith.constant 0 : index
    %c0_12 = arith.constant 0 : index
    %12 = vector.load %arg2[%c1, %c0_11, %c0_12] : memref<8x128x128xbf16, #tpu.memory_space<vmem>>, vector<1x128x128xbf16>
    %13 = vector.shape_cast %12 : vector<1x128x128xbf16> to vector<128x128xbf16>
    %cst_13 = arith.constant dense<0.000000e+00> : vector<48x128xf32>
    %14 = tpu.matmul %11, %13, %cst_13 {dimension_numbers = #tpu.dot_dimension_numbers<[1], [0], [0], [1], [0, 0, 1, 1], [], []>} : vector<48x128xbf16>, vector<128x128xbf16>, vector<48x128xf32> -> vector<48x128xf32>
    %15 = arith.addf %9, %14 : vector<48x128xf32>
    %c7 = arith.constant 7 : index
    %c0_14 = arith.constant 0 : index
    %16 = vector.load %arg0[%c7, %c0_14] : memref<64x128xf32, #tpu.memory_space<vmem>>, vector<48x128xf32>
    %17 = arith.truncf %16 : vector<48x128xf32> to vector<48x128xbf16>
    %c2 = arith.constant 2 : index
    %c0_15 = arith.constant 0 : index
    %c0_16 = arith.constant 0 : index
    %18 = vector.load %arg2[%c2, %c0_15, %c0_16] : memref<8x128x128xbf16, #tpu.memory_space<vmem>>, vector<1x128x128xbf16>
    %19 = vector.shape_cast %18 : vector<1x128x128xbf16> to vector<128x128xbf16>
    %cst_17 = arith.constant dense<0.000000e+00> : vector<48x128xf32>
    %20 = tpu.matmul %17, %19, %cst_17 {dimension_numbers = #tpu.dot_dimension_numbers<[1], [0], [0], [1], [0, 0, 1, 1], [], []>} : vector<48x128xbf16>, vector<128x128xbf16>, vector<48x128xf32> -> vector<48x128xf32>
    %21 = arith.addf %15, %20 : vector<48x128xf32>
    %c8 = arith.constant 8 : index
    %c0_18 = arith.constant 0 : index
    %22 = vector.load %arg0[%c8, %c0_18] : memref<64x128xf32, #tpu.memory_space<vmem>>, vector<48x128xf32>
    %23 = arith.truncf %22 : vector<48x128xf32> to vector<48x128xbf16>
    %c3 = arith.constant 3 : index
    %c0_19 = arith.constant 0 : index
    %c0_20 = arith.constant 0 : index
    %24 = vector.load %arg2[%c3, %c0_19, %c0_20] : memref<8x128x128xbf16, #tpu.memory_space<vmem>>, vector<1x128x128xbf16>
    %25 = vector.shape_cast %24 : vector<1x128x128xbf16> to vector<128x128xbf16>
    %cst_21 = arith.constant dense<0.000000e+00> : vector<48x128xf32>
    %26 = tpu.matmul %23, %25, %cst_21 {dimension_numbers = #tpu.dot_dimension_numbers<[1], [0], [0], [1], [0, 0, 1, 1], [], []>} : vector<48x128xbf16>, vector<128x128xbf16>, vector<48x128xf32> -> vector<48x128xf32>
    %27 = arith.addf %21, %26 : vector<48x128xf32>
    %c9 = arith.constant 9 : index
    %c0_22 = arith.constant 0 : index
    %28 = vector.load %arg0[%c9, %c0_22] : memref<64x128xf32, #tpu.memory_space<vmem>>, vector<48x128xf32>
    %29 = arith.truncf %28 : vector<48x128xf32> to vector<48x128xbf16>
    %c4 = arith.constant 4 : index
    %c0_23 = arith.constant 0 : index
    %c0_24 = arith.constant 0 : index
    %30 = vector.load %arg2[%c4, %c0_23, %c0_24] : memref<8x128x128xbf16, #tpu.memory_space<vmem>>, vector<1x128x128xbf16>
    %31 = vector.shape_cast %30 : vector<1x128x128xbf16> to vector<128x128xbf16>
    %cst_25 = arith.constant dense<0.000000e+00> : vector<48x128xf32>
    %32 = tpu.matmul %29, %31, %cst_25 {dimension_numbers = #tpu.dot_dimension_numbers<[1], [0], [0], [1], [0, 0, 1, 1], [], []>} : vector<48x128xbf16>, vector<128x128xbf16>, vector<48x128xf32> -> vector<48x128xf32>
    %33 = arith.addf %27, %32 : vector<48x128xf32>
    %c10 = arith.constant 10 : index
    %c0_26 = arith.constant 0 : index
    %34 = vector.load %arg0[%c10, %c0_26] : memref<64x128xf32, #tpu.memory_space<vmem>>, vector<48x128xf32>
    %35 = arith.truncf %34 : vector<48x128xf32> to vector<48x128xbf16>
    %c5_27 = arith.constant 5 : index
    %c0_28 = arith.constant 0 : index
    %c0_29 = arith.constant 0 : index
    %36 = vector.load %arg2[%c5_27, %c0_28, %c0_29] : memref<8x128x128xbf16, #tpu.memory_space<vmem>>, vector<1x128x128xbf16>
    %37 = vector.shape_cast %36 : vector<1x128x128xbf16> to vector<128x128xbf16>
    %cst_30 = arith.constant dense<0.000000e+00> : vector<48x128xf32>
    %38 = tpu.matmul %35, %37, %cst_30 {dimension_numbers = #tpu.dot_dimension_numbers<[1], [0], [0], [1], [0, 0, 1, 1], [], []>} : vector<48x128xbf16>, vector<128x128xbf16>, vector<48x128xf32> -> vector<48x128xf32>
    %39 = arith.addf %33, %38 : vector<48x128xf32>
    %c11 = arith.constant 11 : index
    %c0_31 = arith.constant 0 : index
    %40 = vector.load %arg0[%c11, %c0_31] : memref<64x128xf32, #tpu.memory_space<vmem>>, vector<48x128xf32>
    %41 = arith.truncf %40 : vector<48x128xf32> to vector<48x128xbf16>
    %c6_32 = arith.constant 6 : index
    %c0_33 = arith.constant 0 : index
    %c0_34 = arith.constant 0 : index
    %42 = vector.load %arg2[%c6_32, %c0_33, %c0_34] : memref<8x128x128xbf16, #tpu.memory_space<vmem>>, vector<1x128x128xbf16>
    %43 = vector.shape_cast %42 : vector<1x128x128xbf16> to vector<128x128xbf16>
    %cst_35 = arith.constant dense<0.000000e+00> : vector<48x128xf32>
    %44 = tpu.matmul %41, %43, %cst_35 {dimension_numbers = #tpu.dot_dimension_numbers<[1], [0], [0], [1], [0, 0, 1, 1], [], []>} : vector<48x128xbf16>, vector<128x128xbf16>, vector<48x128xf32> -> vector<48x128xf32>
    %45 = arith.addf %39, %44 : vector<48x128xf32>
    %c12 = arith.constant 12 : index
    %c0_36 = arith.constant 0 : index
    %46 = vector.load %arg0[%c12, %c0_36] : memref<64x128xf32, #tpu.memory_space<vmem>>, vector<48x128xf32>
    %47 = arith.truncf %46 : vector<48x128xf32> to vector<48x128xbf16>
    %c7_37 = arith.constant 7 : index
    %c0_38 = arith.constant 0 : index
    %c0_39 = arith.constant 0 : index
    %48 = vector.load %arg2[%c7_37, %c0_38, %c0_39] : memref<8x128x128xbf16, #tpu.memory_space<vmem>>, vector<1x128x128xbf16>
    %49 = vector.shape_cast %48 : vector<1x128x128xbf16> to vector<128x128xbf16>
    %cst_40 = arith.constant dense<0.000000e+00> : vector<48x128xf32>
    %50 = tpu.matmul %47, %49, %cst_40 {dimension_numbers = #tpu.dot_dimension_numbers<[1], [0], [0], [1], [0, 0, 1, 1], [], []>} : vector<48x128xbf16>, vector<128x128xbf16>, vector<48x128xf32> -> vector<48x128xf32>
    %51 = arith.addf %45, %50 : vector<48x128xf32>
    %52 = vector.broadcast %0 : vector<48x1xf32> to vector<48x128xf32>
    %53 = arith.mulf %51, %52 : vector<48x128xf32>
    %cst_41 = arith.constant dense<0.000000e+00> : vector<128xf32>
    %54 = vector.multi_reduction <add>, %53, %cst_41 [0] : vector<48x128xf32> to vector<128xf32>
    %55 = vector.shape_cast %54 : vector<128xf32> to vector<1x128xf32>
    %56 = arith.mulf %53, %53 : vector<48x128xf32>
    %cst_42 = arith.constant dense<0.000000e+00> : vector<128xf32>
    %57 = vector.multi_reduction <add>, %56, %cst_42 [0] : vector<48x128xf32> to vector<128xf32>
    %58 = vector.shape_cast %57 : vector<128xf32> to vector<1x128xf32>
    %cst_43 = arith.constant 3.125000e-02 : f32
    %59 = vector.broadcast %cst_43 : f32 to vector<1x128xf32>
    %60 = arith.mulf %55, %59 : vector<1x128xf32>
    %cst_44 = arith.constant 3.125000e-02 : f32
    %61 = vector.broadcast %cst_44 : f32 to vector<1x128xf32>
    %62 = arith.mulf %58, %61 : vector<1x128xf32>
    %63 = arith.mulf %60, %60 : vector<1x128xf32>
    %64 = arith.subf %62, %63 : vector<1x128xf32>
    %c0_45 = arith.constant 0 : index
    %c0_46 = arith.constant 0 : index
    %65 = vector.load %arg3[%c0_45, %c0_46] : memref<1x128xf32, #tpu.memory_space<vmem>>, vector<1x128xf32>
    %cst_47 = arith.constant 9.99999974E-6 : f32
    %66 = vector.broadcast %cst_47 : f32 to vector<1x128xf32>
    %67 = arith.addf %64, %66 : vector<1x128xf32>
    %68 = math.rsqrt %67 : vector<1x128xf32>
    %69 = arith.mulf %65, %68 : vector<1x128xf32>
    %c0_48 = arith.constant 0 : index
    %c0_49 = arith.constant 0 : index
    %70 = vector.load %arg4[%c0_48, %c0_49] : memref<1x128xf32, #tpu.memory_space<vmem>>, vector<1x128xf32>
    %71 = arith.mulf %60, %69 : vector<1x128xf32>
    %72 = arith.subf %70, %71 : vector<1x128xf32>
    %73 = vector.broadcast %69 : vector<1x128xf32> to vector<48x128xf32>
    %74 = arith.mulf %51, %73 : vector<48x128xf32>
    %75 = vector.broadcast %72 : vector<1x128xf32> to vector<48x128xf32>
    %76 = arith.addf %74, %75 : vector<48x128xf32>
    %cst_50 = arith.constant 0.000000e+00 : f32
    %77 = vector.broadcast %cst_50 : f32 to vector<48x128xf32>
    %78 = arith.maximumf %76, %77 : vector<48x128xf32>
    %79 = vector.broadcast %0 : vector<48x1xf32> to vector<48x128xf32>
    %80 = arith.mulf %78, %79 : vector<48x128xf32>
    %c8_51 = arith.constant 8 : index
    %c0_52 = arith.constant 0 : index
    %81 = vector.load %arg15[%c8_51, %c0_52] : memref<64x128xf32, #tpu.memory_space<vmem>>, vector<48x128xf32>
    tpu.vector_store %arg15[%c8_51, %c0_52], %80 {strides = array<i32>} : memref<64x128xf32, #tpu.memory_space<vmem>>, vector<48x128xf32>,
    %c6_53 = arith.constant 6 : index
    %c0_54 = arith.constant 0 : index
    %82 = vector.load %arg15[%c6_53, %c0_54] : memref<64x128xf32, #tpu.memory_space<vmem>>, vector<48x128xf32>
    %83 = arith.truncf %82 : vector<48x128xf32> to vector<48x128xbf16>
    %c0_55 = arith.constant 0 : index
    %c0_56 = arith.constant 0 : index
    %c0_57 = arith.constant 0 : index
    %84 = vector.load %arg5[%c0_55, %c0_56, %c0_57] : memref<5x128x128xbf16, #tpu.memory_space<vmem>>, vector<1x128x128xbf16>
    %85 = vector.shape_cast %84 : vector<1x128x128xbf16> to vector<128x128xbf16>
    %cst_58 = arith.constant dense<0.000000e+00> : vector<48x128xf32>
    %86 = tpu.matmul %83, %85, %cst_58 {dimension_numbers = #tpu.dot_dimension_numbers<[1], [0], [0], [1], [0, 0, 1, 1], [], []>} : vector<48x128xbf16>, vector<128x128xbf16>, vector<48x128xf32> -> vector<48x128xf32>
    %c7_59 = arith.constant 7 : index
    %c0_60 = arith.constant 0 : index
    %87 = vector.load %arg15[%c7_59, %c0_60] : memref<64x128xf32, #tpu.memory_space<vmem>>, vector<48x128xf32>
    %88 = arith.truncf %87 : vector<48x128xf32> to vector<48x128xbf16>
    %c1_61 = arith.constant 1 : index
    %c0_62 = arith.constant 0 : index
    %c0_63 = arith.constant 0 : index
    %89 = vector.load %arg5[%c1_61, %c0_62, %c0_63] : memref<5x128x128xbf16, #tpu.memory_space<vmem>>, vector<1x128x128xbf16>
    %90 = vector.shape_cast %89 : vector<1x128x128xbf16> to vector<128x128xbf16>
    %cst_64 = arith.constant dense<0.000000e+00> : vector<48x128xf32>
    %91 = tpu.matmul %88, %90, %cst_64 {dimension_numbers = #tpu.dot_dimension_numbers<[1], [0], [0], [1], [0, 0, 1, 1], [], []>} : vector<48x128xbf16>, vector<128x128xbf16>, vector<48x128xf32> -> vector<48x128xf32>
    %92 = arith.addf %86, %91 : vector<48x128xf32>
    %c8_65 = arith.constant 8 : index
    %c0_66 = arith.constant 0 : index
    %93 = vector.load %arg15[%c8_65, %c0_66] : memref<64x128xf32, #tpu.memory_space<vmem>>, vector<48x128xf32>
    %94 = arith.truncf %93 : vector<48x128xf32> to vector<48x128xbf16>
    %c2_67 = arith.constant 2 : index
    %c0_68 = arith.constant 0 : index
    %c0_69 = arith.constant 0 : index
    %95 = vector.load %arg5[%c2_67, %c0_68, %c0_69] : memref<5x128x128xbf16, #tpu.memory_space<vmem>>, vector<1x128x128xbf16>
    %96 = vector.shape_cast %95 : vector<1x128x128xbf16> to vector<128x128xbf16>
    %cst_70 = arith.constant dense<0.000000e+00> : vector<48x128xf32>
    %97 = tpu.matmul %94, %96, %cst_70 {dimension_numbers = #tpu.dot_dimension_numbers<[1], [0], [0], [1], [0, 0, 1, 1], [], []>} : vector<48x128xbf16>, vector<128x128xbf16>, vector<48x128xf32> -> vector<48x128xf32>
    %98 = arith.addf %92, %97 : vector<48x128xf32>
    %c9_71 = arith.constant 9 : index
    %c0_72 = arith.constant 0 : index
    %99 = vector.load %arg15[%c9_71, %c0_72] : memref<64x128xf32, #tpu.memory_space<vmem>>, vector<48x128xf32>
    %100 = arith.truncf %99 : vector<48x128xf32> to vector<48x128xbf16>
    %c3_73 = arith.constant 3 : index
    %c0_74 = arith.constant 0 : index
    %c0_75 = arith.constant 0 : index
    %101 = vector.load %arg5[%c3_73, %c0_74, %c0_75] : memref<5x128x128xbf16, #tpu.memory_space<vmem>>, vector<1x128x128xbf16>
    %102 = vector.shape_cast %101 : vector<1x128x128xbf16> to vector<128x128xbf16>
    %cst_76 = arith.constant dense<0.000000e+00> : vector<48x128xf32>
    %103 = tpu.matmul %100, %102, %cst_76 {dimension_numbers = #tpu.dot_dimension_numbers<[1], [0], [0], [1], [0, 0, 1, 1], [], []>} : vector<48x128xbf16>, vector<128x128xbf16>, vector<48x128xf32> -> vector<48x128xf32>
    %104 = arith.addf %98, %103 : vector<48x128xf32>
    %c10_77 = arith.constant 10 : index
    %c0_78 = arith.constant 0 : index
    %105 = vector.load %arg15[%c10_77, %c0_78] : memref<64x128xf32, #tpu.memory_space<vmem>>, vector<48x128xf32>
    %106 = arith.truncf %105 : vector<48x128xf32> to vector<48x128xbf16>
    %c4_79 = arith.constant 4 : index
    %c0_80 = arith.constant 0 : index
    %c0_81 = arith.constant 0 : index
    %107 = vector.load %arg5[%c4_79, %c0_80, %c0_81] : memref<5x128x128xbf16, #tpu.memory_space<vmem>>, vector<1x128x128xbf16>
    %108 = vector.shape_cast %107 : vector<1x128x128xbf16> to vector<128x128xbf16>
    %cst_82 = arith.constant dense<0.000000e+00> : vector<48x128xf32>
    %109 = tpu.matmul %106, %108, %cst_82 {dimension_numbers = #tpu.dot_dimension_numbers<[1], [0], [0], [1], [0, 0, 1, 1], [], []>} : vector<48x128xbf16>, vector<128x128xbf16>, vector<48x128xf32> -> vector<48x128xf32>
    %110 = arith.addf %104, %109 : vector<48x128xf32>
    %111 = vector.broadcast %0 : vector<48x1xf32> to vector<48x128xf32>
    %112 = arith.mulf %110, %111 : vector<48x128xf32>
    %cst_83 = arith.constant dense<0.000000e+00> : vector<128xf32>
    %113 = vector.multi_reduction <add>, %112, %cst_83 [0] : vector<48x128xf32> to vector<128xf32>
    %114 = vector.shape_cast %113 : vector<128xf32> to vector<1x128xf32>
    %115 = arith.mulf %112, %112 : vector<48x128xf32>
    %cst_84 = arith.constant dense<0.000000e+00> : vector<128xf32>
    %116 = vector.multi_reduction <add>, %115, %cst_84 [0] : vector<48x128xf32> to vector<128xf32>
    %117 = vector.shape_cast %116 : vector<128xf32> to vector<1x128xf32>
    %cst_85 = arith.constant 3.125000e-02 : f32
    %118 = vector.broadcast %cst_85 : f32 to vector<1x128xf32>
    %119 = arith.mulf %114, %118 : vector<1x128xf32>
    %cst_86 = arith.constant 3.125000e-02 : f32
    %120 = vector.broadcast %cst_86 : f32 to vector<1x128xf32>
    %121 = arith.mulf %117, %120 : vector<1x128xf32>
    %122 = arith.mulf %119, %119 : vector<1x128xf32>
    %123 = arith.subf %121, %122 : vector<1x128xf32>
    %c0_87 = arith.constant 0 : index
    %c0_88 = arith.constant 0 : index
    %124 = vector.load %arg6[%c0_87, %c0_88] : memref<1x128xf32, #tpu.memory_space<vmem>>, vector<1x128xf32>
    %cst_89 = arith.constant 9.99999974E-6 : f32
    %125 = vector.broadcast %cst_89 : f32 to vector<1x128xf32>
    %126 = arith.addf %123, %125 : vector<1x128xf32>
    %127 = math.rsqrt %126 : vector<1x128xf32>
    %128 = arith.mulf %124, %127 : vector<1x128xf32>
    %c0_90 = arith.constant 0 : index
    %c0_91 = arith.constant 0 : index
    %129 = vector.load %arg7[%c0_90, %c0_91] : memref<1x128xf32, #tpu.memory_space<vmem>>, vector<1x128xf32>
    %130 = arith.mulf %119, %128 : vector<1x128xf32>
    %131 = arith.subf %129, %130 : vector<1x128xf32>
    %132 = vector.broadcast %128 : vector<1x128xf32> to vector<48x128xf32>
    %133 = arith.mulf %110, %132 : vector<48x128xf32>
    %134 = vector.broadcast %131 : vector<1x128xf32> to vector<48x128xf32>
    %135 = arith.addf %133, %134 : vector<48x128xf32>
    %cst_92 = arith.constant 0.000000e+00 : f32
    %136 = vector.broadcast %cst_92 : f32 to vector<48x128xf32>
    %137 = arith.maximumf %135, %136 : vector<48x128xf32>
    %138 = vector.broadcast %0 : vector<48x1xf32> to vector<48x128xf32>
    %139 = arith.mulf %137, %138 : vector<48x128xf32>
    %c8_93 = arith.constant 8 : index
    %c0_94 = arith.constant 0 : index
    %140 = vector.load %arg15[%c8_93, %c0_94] : memref<64x128xf32, #tpu.memory_space<vmem>>, vector<48x128xf32>
    tpu.vector_store %arg15[%c8_93, %c0_94], %139 {strides = array<i32>} : memref<64x128xf32, #tpu.memory_space<vmem>>, vector<48x128xf32>,
    %c7_95 = arith.constant 7 : index
    %c0_96 = arith.constant 0 : index
    %141 = vector.load %arg15[%c7_95, %c0_96] : memref<64x128xf32, #tpu.memory_space<vmem>>, vector<48x128xf32>
    %142 = arith.truncf %141 : vector<48x128xf32> to vector<48x128xbf16>
    %c0_97 = arith.constant 0 : index
    %c0_98 = arith.constant 0 : index
    %c0_99 = arith.constant 0 : index
    %143 = vector.load %arg8[%c0_97, %c0_98, %c0_99] : memref<3x128x128xbf16, #tpu.memory_space<vmem>>, vector<1x128x128xbf16>
    %144 = vector.shape_cast %143 : vector<1x128x128xbf16> to vector<128x128xbf16>
    %cst_100 = arith.constant dense<0.000000e+00> : vector<48x128xf32>
    %145 = tpu.matmul %142, %144, %cst_100 {dimension_numbers = #tpu.dot_dimension_numbers<[1], [0], [0], [1], [0, 0, 1, 1], [], []>} : vector<48x128xbf16>, vector<128x128xbf16>, vector<48x128xf32> -> vector<48x128xf32>
    %c8_101 = arith.constant 8 : index
    %c0_102 = arith.constant 0 : index
    %146 = vector.load %arg15[%c8_101, %c0_102] : memref<64x128xf32, #tpu.memory_space<vmem>>, vector<48x128xf32>
    %147 = arith.truncf %146 : vector<48x128xf32> to vector<48x128xbf16>
    %c1_103 = arith.constant 1 : index
    %c0_104 = arith.constant 0 : index
    %c0_105 = arith.constant 0 : index
    %148 = vector.load %arg8[%c1_103, %c0_104, %c0_105] : memref<3x128x128xbf16, #tpu.memory_space<vmem>>, vector<1x128x128xbf16>
    %149 = vector.shape_cast %148 : vector<1x128x128xbf16> to vector<128x128xbf16>
    %cst_106 = arith.constant dense<0.000000e+00> : vector<48x128xf32>
    %150 = tpu.matmul %147, %149, %cst_106 {dimension_numbers = #tpu.dot_dimension_numbers<[1], [0], [0], [1], [0, 0, 1, 1], [], []>} : vector<48x128xbf16>, vector<128x128xbf16>, vector<48x128xf32> -> vector<48x128xf32>
    %151 = arith.addf %145, %150 : vector<48x128xf32>
    %c9_107 = arith.constant 9 : index
    %c0_108 = arith.constant 0 : index
    %152 = vector.load %arg15[%c9_107, %c0_108] : memref<64x128xf32, #tpu.memory_space<vmem>>, vector<48x128xf32>
    %153 = arith.truncf %152 : vector<48x128xf32> to vector<48x128xbf16>
    %c2_109 = arith.constant 2 : index
    %c0_110 = arith.constant 0 : index
    %c0_111 = arith.constant 0 : index
    %154 = vector.load %arg8[%c2_109, %c0_110, %c0_111] : memref<3x128x128xbf16, #tpu.memory_space<vmem>>, vector<1x128x128xbf16>
    %155 = vector.shape_cast %154 : vector<1x128x128xbf16> to vector<128x128xbf16>
    %cst_112 = arith.constant dense<0.000000e+00> : vector<48x128xf32>
    %156 = tpu.matmul %153, %155, %cst_112 {dimension_numbers = #tpu.dot_dimension_numbers<[1], [0], [0], [1], [0, 0, 1, 1], [], []>} : vector<48x128xbf16>, vector<128x128xbf16>, vector<48x128xf32> -> vector<48x128xf32>
    %157 = arith.addf %151, %156 : vector<48x128xf32>
    %158 = vector.broadcast %0 : vector<48x1xf32> to vector<48x128xf32>
    %159 = arith.mulf %157, %158 : vector<48x128xf32>
    %cst_113 = arith.constant dense<0.000000e+00> : vector<128xf32>
    %160 = vector.multi_reduction <add>, %159, %cst_113 [0] : vector<48x128xf32> to vector<128xf32>
    %161 = vector.shape_cast %160 : vector<128xf32> to vector<1x128xf32>
    %162 = arith.mulf %159, %159 : vector<48x128xf32>
    %cst_114 = arith.constant dense<0.000000e+00> : vector<128xf32>
    %163 = vector.multi_reduction <add>, %162, %cst_114 [0] : vector<48x128xf32> to vector<128xf32>
    %164 = vector.shape_cast %163 : vector<128xf32> to vector<1x128xf32>
    %cst_115 = arith.constant 3.125000e-02 : f32
    %165 = vector.broadcast %cst_115 : f32 to vector<1x128xf32>
    %166 = arith.mulf %161, %165 : vector<1x128xf32>
    %cst_116 = arith.constant 3.125000e-02 : f32
    %167 = vector.broadcast %cst_116 : f32 to vector<1x128xf32>
    %168 = arith.mulf %164, %167 : vector<1x128xf32>
    %169 = arith.mulf %166, %166 : vector<1x128xf32>
    %170 = arith.subf %168, %169 : vector<1x128xf32>
    %c0_117 = arith.constant 0 : index
    %c0_118 = arith.constant 0 : index
    %171 = vector.load %arg9[%c0_117, %c0_118] : memref<1x128xf32, #tpu.memory_space<vmem>>, vector<1x128xf32>
    %cst_119 = arith.constant 9.99999974E-6 : f32
    %172 = vector.broadcast %cst_119 : f32 to vector<1x128xf32>
    %173 = arith.addf %170, %172 : vector<1x128xf32>
    %174 = math.rsqrt %173 : vector<1x128xf32>
    %175 = arith.mulf %171, %174 : vector<1x128xf32>
    %c0_120 = arith.constant 0 : index
    %c0_121 = arith.constant 0 : index
    %176 = vector.load %arg10[%c0_120, %c0_121] : memref<1x128xf32, #tpu.memory_space<vmem>>, vector<1x128xf32>
    %177 = arith.mulf %166, %175 : vector<1x128xf32>
    %178 = arith.subf %176, %177 : vector<1x128xf32>
    %179 = vector.broadcast %175 : vector<1x128xf32> to vector<48x128xf32>
    %180 = arith.mulf %157, %179 : vector<48x128xf32>
    %181 = vector.broadcast %178 : vector<1x128xf32> to vector<48x128xf32>
    %182 = arith.addf %180, %181 : vector<48x128xf32>
    %cst_122 = arith.constant 0.000000e+00 : f32
    %183 = vector.broadcast %cst_122 : f32 to vector<48x128xf32>
    %184 = arith.maximumf %182, %183 : vector<48x128xf32>
    %c8_123 = arith.constant 8 : index
    %c0_124 = arith.constant 0 : index
    %185 = vector.load %arg0[%c8_123, %c0_124] : memref<64x128xf32, #tpu.memory_space<vmem>>, vector<48x128xf32>
    %186 = arith.truncf %185 : vector<48x128xf32> to vector<48x128xbf16>
    %c0_125 = arith.constant 0 : index
    %c0_126 = arith.constant 0 : index
    %187 = vector.load %arg11[%c0_125, %c0_126] : memref<128x128xbf16, #tpu.memory_space<vmem>>, vector<128x128xbf16>
    %cst_127 = arith.constant dense<0.000000e+00> : vector<48x128xf32>
    %188 = tpu.matmul %186, %187, %cst_127 {dimension_numbers = #tpu.dot_dimension_numbers<[1], [0], [0], [1], [0, 0, 1, 1], [], []>} : vector<48x128xbf16>, vector<128x128xbf16>, vector<48x128xf32> -> vector<48x128xf32>
    %189 = vector.broadcast %0 : vector<48x1xf32> to vector<48x128xf32>
    %190 = arith.mulf %188, %189 : vector<48x128xf32>
    %cst_128 = arith.constant dense<0.000000e+00> : vector<128xf32>
    %191 = vector.multi_reduction <add>, %190, %cst_128 [0] : vector<48x128xf32> to vector<128xf32>
    %192 = vector.shape_cast %191 : vector<128xf32> to vector<1x128xf32>
    %193 = arith.mulf %190, %190 : vector<48x128xf32>
    %cst_129 = arith.constant dense<0.000000e+00> : vector<128xf32>
    %194 = vector.multi_reduction <add>, %193, %cst_129 [0] : vector<48x128xf32> to vector<128xf32>
    %195 = vector.shape_cast %194 : vector<128xf32> to vector<1x128xf32>
    %cst_130 = arith.constant 3.125000e-02 : f32
    %196 = vector.broadcast %cst_130 : f32 to vector<1x128xf32>
    %197 = arith.mulf %192, %196 : vector<1x128xf32>
    %cst_131 = arith.constant 3.125000e-02 : f32
    %198 = vector.broadcast %cst_131 : f32 to vector<1x128xf32>
    %199 = arith.mulf %195, %198 : vector<1x128xf32>
    %200 = arith.mulf %197, %197 : vector<1x128xf32>
    %201 = arith.subf %199, %200 : vector<1x128xf32>
    %c0_132 = arith.constant 0 : index
    %c0_133 = arith.constant 0 : index
    %202 = vector.load %arg12[%c0_132, %c0_133] : memref<1x128xf32, #tpu.memory_space<vmem>>, vector<1x128xf32>
    %cst_134 = arith.constant 9.99999974E-6 : f32
    %203 = vector.broadcast %cst_134 : f32 to vector<1x128xf32>
    %204 = arith.addf %201, %203 : vector<1x128xf32>
    %205 = math.rsqrt %204 : vector<1x128xf32>
    %206 = arith.mulf %202, %205 : vector<1x128xf32>
    %c0_135 = arith.constant 0 : index
    %c0_136 = arith.constant 0 : index
    %207 = vector.load %arg13[%c0_135, %c0_136] : memref<1x128xf32, #tpu.memory_space<vmem>>, vector<1x128xf32>
    %208 = arith.mulf %197, %206 : vector<1x128xf32>
    %209 = arith.subf %207, %208 : vector<1x128xf32>
    %210 = vector.broadcast %206 : vector<1x128xf32> to vector<48x128xf32>
    %211 = arith.mulf %188, %210 : vector<48x128xf32>
    %212 = vector.broadcast %209 : vector<1x128xf32> to vector<48x128xf32>
    %213 = arith.addf %211, %212 : vector<48x128xf32>
    %214 = arith.addf %184, %213 : vector<48x128xf32>
    %c0_137 = arith.constant 0 : index
    %c0_138 = arith.constant 0 : index
    %215 = vector.load %arg14[%c0_137, %c0_138] : memref<48x128xf32, #tpu.memory_space<vmem>>, vector<48x128xf32>
    tpu.vector_store %arg14[%c0_137, %c0_138], %214 {strides = array<i32>} : memref<48x128xf32, #tpu.memory_space<vmem>>, vector<48x128xf32>,
    return
  }
}

</mosaic_0001>

<bundles_post_ra>
// kernel: resnet_block_forward.1
= control target key start
LH: loop header
LB: loop body
LE: loop exit
PB: predicated region body
PF: predicated region fallthrough
CT: control target
= control target key end

     0   :  { %v4041_v0 = vmov 0.0   ;;  %vm4042_vm0 = vmmov 0   ;;  %s5184_s2 = inlined_call_operand.vmem [shape: bf16[8,128,128], index: 2, kind: input, shape index: {}]   ;;  %s5185_s0 = inlined_call_operand.vmem [shape: f32[64,128], index: 0, kind: input, shape index: {}]   ;;  %s5186_s11 = inlined_call_operand.vmem [shape: bf16[128,128], index: 11, kind: input, shape index: {}]   ;;  %s5187_s1 = inlined_call_operand.vmem [shape: f32[48,1], index: 1, kind: input, shape index: {}]   ;;  %s5188_s5 = inlined_call_operand.vmem [shape: bf16[5,128,128], index: 5, kind: input, shape index: {}]   ;;  %s5189_s3 = inlined_call_operand.vmem [shape: f32[1,128], index: 3, kind: input, shape index: {}]   ;;  %s5190_s4 = inlined_call_operand.vmem [shape: f32[1,128], index: 4, kind: input, shape index: {}]   ;;  %s5191_s8 = inlined_call_operand.vmem [shape: bf16[3,128,128], index: 8, kind: input, shape index: {}]   ;;  %s5192_s6 = inlined_call_operand.vmem [shape: f32[1,128], index: 6, kind: input, shape index: {}]   ;;  %s5193_s7 = inlined_call_operand.vmem [shape: f32[1,128], index: 7, kind: input, shape index: {}]   ;;  %s5194_s9 = inlined_call_operand.vmem [shape: f32[1,128], index: 9, kind: input, shape index: {}]   ;;  %s5195_s10 = inlined_call_operand.vmem [shape: f32[1,128], index: 10, kind: input, shape index: {}]   ;;  %s5196_s12 = inlined_call_operand.vmem [shape: f32[1,128], index: 12, kind: input, shape index: {}]   ;;  %s5197_s13 = inlined_call_operand.vmem [shape: f32[1,128], index: 13, kind: input, shape index: {}]   ;;  %s5198_s14 = inlined_call_operand.vmem [shape: f32[48,128], index: 14, kind: output, shape index: {}]  }
   0x1   :  { %3234 = vmatprep.subr.bf16.mxu0 %v4041_v0  ;;  %54 = vst [vmem:[#allocation2] sm:$0xff] %v4041_v0  ;;  %55 = vst [vmem:[#allocation2 + $0x38] sm:$0xff] %v4041_v0  ;;  %v3887_v1 = vld [vmem:[%s5184_s2 + $0x40] sm:$0xff]   ;;  %3250 = vmatprep.mubr.msk.bf16.mxu0 %vm4042_vm0, %v4041_v0  ;;  %v3888_v2 = vld [vmem:[%s5184_s2 + $0x48] sm:$0xff]  }
   0x2   :  { %3458 = vmatprep.subr.bf16.mxu1 %v4041_v0  ;;  %3474 = vmatprep.mubr.msk.bf16.mxu1 %vm4042_vm0, %v4041_v0  ;;  %v3889_v3 = vld [vmem:[%s5184_s2 + $0x50] sm:$0xff]   ;;  %v3890_v4 = vld [vmem:[%s5184_s2 + $0x58] sm:$0xff]   ;;  %v3891_v5 = vld [vmem:[%s5184_s2 + $0x60] sm:$0xff]  }
   0x3   :  { %3235 = vmatpush3.bf16.msra.mxu0 %v3887_v1  ;;  %v3892_v6 = vld [vmem:[%s5184_s2 + $0x68] sm:$0xff]   ;;  %v3893_v7 = vld [vmem:[%s5184_s2 + $0x70] sm:$0xff]   ;;  %v3894_v8 = vld [vmem:[%s5184_s2 + $0x78] sm:$0xff]  }
   0x4   :  { %3236 = vmatprep.subr.bf16.mxu0 %v4041_v0  ;;  %v81_v9 = vld [vmem:[%s5185_s0 + $0x6] sm:$0xff]  ;;  %v82_v10 = vld [vmem:[%s5185_s0 + $0xe] sm:$0xff]  ;;  %v83_v14 = vld [vmem:[%s5185_s0 + $0x16] sm:$0xff] }
   0x5   :  { %v87_v11 = vpack.c.bf16 %v82_v10, %v81_v9  ;;  %v3895_v12 = vld [vmem:[%s5184_s2] sm:$0xff]   ;;  %v3896_v13 = vld [vmem:[%s5184_s2 + $0x8] sm:$0xff]   ;;  %v3897_v17 = vld [vmem:[%s5184_s2 + $0x10] sm:$0xff]  }
   0x6   :  { %v84_v15 = vld [vmem:[%s5185_s0 + $0x1e] sm:$0xff]  ;;  %v85_v19 = vld [vmem:[%s5185_s0 + $0x26] sm:$0xff]  ;;  %v86_v20 = vld [vmem:[%s5185_s0 + $0x2e] sm:$0xff] }
   0x7   :  { %3237 = vmatpush3.bf16.msra.mxu0 %v3888_v2  ;;  %v88_v16 = vpack.c.bf16 %v84_v15, %v83_v14  ;;  %v3898_v18 = vld [vmem:[%s5184_s2 + $0x18] sm:$0xff]   ;;  %v89_v21 = vpack.c.bf16 %v86_v20, %v85_v19  ;;  %v3899_v22 = vld [vmem:[%s5184_s2 + $0x20] sm:$0xff]   ;;  %v3900_v23 = vld [vmem:[%s5184_s2 + $0x28] sm:$0xff]  }
   0x8   :  { %3238 = vmatprep.subr.bf16.mxu0 %v4041_v0  ;;  %v3901_v24 = vld [vmem:[%s5184_s2 + $0x30] sm:$0xff]   ;;  %v3902_v25 = vld [vmem:[%s5184_s2 + $0x38] sm:$0xff]   ;;  %v56_v26 = vld [vmem:[%s5185_s0 + $0x5] sm:$0xff] }
   0x9   :  { %v57_v27 = vld [vmem:[%s5185_s0 + $0xd] sm:$0xff]  ;;  %v3903_v28 = vld [vmem:[%s5184_s2 + $0x80] sm:$0xff]   ;;  %v58_v31 = vld [vmem:[%s5185_s0 + $0x15] sm:$0xff] }
   0xa   :  { %v62_v29 = vpack.c.bf16 %v57_v27, %v56_v26  ;;  %v3904_v30 = vld [vmem:[%s5184_s2 + $0x88] sm:$0xff]   ;;  %v59_v32 = vld [vmem:[%s5185_s0 + $0x1d] sm:$0xff]  ;;  %v3905_v34 = vld [vmem:[%s5184_s2 + $0x90] sm:$0xff]  }
   0xb   :  { %3239 = vmatpush3.bf16.msra.mxu0 %v3889_v3  ;;  %v63_v33 = vpack.c.bf16 %v59_v32, %v58_v31  ;;  %v3906_v35 = vld [vmem:[%s5184_s2 + $0x98] sm:$0xff]   ;;  %v60_v36 = vld [vmem:[%s5185_s0 + $0x25] sm:$0xff]  ;;  %v61_v37 = vld [vmem:[%s5185_s0 + $0x2d] sm:$0xff] }
   0xc   :  { %3240 = vmatprep.subr.bf16.mxu0 %v4041_v0  ;;  %v64_v38 = vpack.c.bf16 %v61_v37, %v60_v36  ;;  %v3907_v39 = vld [vmem:[%s5184_s2 + $0xa0] sm:$0xff]   ;;  %v3908_v40 = vld [vmem:[%s5184_s2 + $0xa8] sm:$0xff]   ;;  %v3909_v41 = vld [vmem:[%s5184_s2 + $0xb0] sm:$0xff]  }
   0xd   :  { %v3910_v42 = vld [vmem:[%s5184_s2 + $0xb8] sm:$0xff]   ;;  %v317_v43 = vld [vmem:[%s5185_s0 + $0x7] sm:$0xff]  ;;  %v318_v44 = vld [vmem:[%s5185_s0 + $0xf] sm:$0xff] }
   0xe   :  { %v323_v45 = vpack.c.bf16 %v318_v44, %v317_v43  ;;  %v3911_v46 = vld [vmem:[%s5184_s2 + $0xc0] sm:$0xff]   ;;  %v3912_v47 = vld [vmem:[%s5184_s2 + $0xc8] sm:$0xff]   ;;  %v319_v48 = vld [vmem:[%s5185_s0 + $0x17] sm:$0xff] }
   0xf   :  { %3241 = vmatpush3.bf16.msra.mxu0 %v3890_v4  ;;  %v320_v49 = vld [vmem:[%s5185_s0 + $0x1f] sm:$0xff]  ;;  %v3913_v51 = vld [vmem:[%s5184_s2 + $0xd0] sm:$0xff]   ;;  %v321_v53 = vld [vmem:[%s5185_s0 + $0x27] sm:$0xff] }
  0x10   :  { %3242 = vmatprep.subr.bf16.mxu0 %v4041_v0  ;;  %v324_v50 = vpack.c.bf16 %v320_v49, %v319_v48  ;;  %v3914_v52 = vld [vmem:[%s5184_s2 + $0xd8] sm:$0xff]   ;;  %v322_v54 = vld [vmem:[%s5185_s0 + $0x2f] sm:$0xff]  ;;  %v3915_v56 = vld [vmem:[%s5184_s2 + $0xe0] sm:$0xff]  }
  0x11   :  { %v325_v55 = vpack.c.bf16 %v322_v54, %v321_v53  ;;  %v3916_v57 = vld [vmem:[%s5184_s2 + $0xe8] sm:$0xff]   ;;  %v3917_v58 = vld [vmem:[%s5184_s2 + $0xf0] sm:$0xff]   ;;  %v3918_v59 = vld [vmem:[%s5184_s2 + $0xf8] sm:$0xff]  }
  0x12   :  { %v454_v60 = vld [vmem:[%s5185_s0 + $0x8] sm:$0xff]  ;;  %v455_v61 = vld [vmem:[%s5185_s0 + $0x10] sm:$0xff]  ;;  %v3919_v63 = vld [vmem:[%s5184_s2 + $0x100] sm:$0xff]  }
  0x13   :  { %3243 = vmatpush3.bf16.msra.mxu0 %v3891_v5  ;;  %v4332_v62 = vpack.c.bf16 %v455_v61, %v454_v60  ;;  %v3920_v1 = vld [vmem:[%s5184_s2 + $0x108] sm:$0xff]   ;;  %v456_v2 = vld [vmem:[%s5185_s0 + $0x18] sm:$0xff]  ;;  %v457_v3 = vld [vmem:[%s5185_s0 + $0x20] sm:$0xff] }
  0x14   :  { %3244 = vmatprep.subr.bf16.mxu0 %v4041_v0  ;;  %v461_v4 = vpack.c.bf16 %v457_v3, %v456_v2  ;;  %v3921_v5 = vld [vmem:[%s5184_s2 + $0x110] sm:$0xff]   ;;  %v3923_v10 = vld [vmem:[%s5184_s2 + $0x120] sm:$0xff]   ;;  %v51_v27 = vld [vmem:[%s5187_s1 + $0x18] sm:$0xff] }
  0x15   :  { %v591_v14 = vld [vmem:[%s5185_s0 + $0x9] sm:$0xff]  ;;  %v592_v15 = vld [vmem:[%s5185_s0 + $0x11] sm:$0xff]  ;;  %v593_v19 = vld [vmem:[%s5185_s0 + $0x19] sm:$0xff] }
  0x16   :  { %v594_v20 = vld [vmem:[%s5185_s0 + $0x21] sm:$0xff]  ;;  %v3929_v26 = vld [vmem:[%s5184_s2 + $0x150] sm:$0xff]   ;;  %v3934_v37 = vld [vmem:[%s5184_s2 + $0x178] sm:$0xff]  }
  0x17   :  { %3245 = vmatpush3.bf16.msra.mxu0 %v3892_v6  ;;  %v3922_v6 = vld [vmem:[%s5184_s2 + $0x118] sm:$0xff]   ;;  %v53_v32 = vld [vmem:[%s5187_s1 + $0x28] sm:$0xff]  ;;  %v3933_v36 = vld [vmem:[%s5184_s2 + $0x170] sm:$0xff]  }
  0x18   :  { %3246 = vmatprep.subr.bf16.mxu0 %v4041_v0  ;;  %v596_v31 = vld [vmem:[%s5185_s0 + $0x31] sm:$0xff]  ;;  %v730_v43 = vld [vmem:[%s5185_s0 + $0x1a] sm:$0xff]  ;;  %v731_v44 = vld [vmem:[%s5185_s0 + $0x22] sm:$0xff] }
  0x19   :  { %v732_v48 = vld [vmem:[%s5185_s0 + $0x2a] sm:$0xff]  ;;  %v733_v49 = vld [vmem:[%s5185_s0 + $0x32] sm:$0xff]  ;;  %v867_v60 = vld [vmem:[%s5185_s0 + $0x1b] sm:$0xff] }
  0x1a   :  { %v3941_v53 = vld [vmem:[%s5184_s2 + $0x1b0] sm:$0xff]   ;;  %v3942_v54 = vld [vmem:[%s5184_s2 + $0x1b8] sm:$0xff]   ;;  %v868_v61 = vld [vmem:[%s5185_s0 + $0x23] sm:$0xff] }
  0x1b   :  { %3247 = vmatpush3.bf16.msra.mxu0 %v3893_v7  ;;  %v458_v7 = vld [vmem:[%s5185_s0 + $0x28] sm:$0xff]  ;;  %v3946_v2 = vld [vmem:[%s5184_s2 + $0x1d8] sm:$0xff]  }
  0x1c   :  { %3248 = vmatprep.subr.bf16.mxu0 %v4041_v0  ;;  %v869_v3 = vld [vmem:[%s5185_s0 + $0x2b] sm:$0xff] }
  0x1f   :  { %3249 = vmatpush3.bf16.msra.mxu0 %v3894_v8  ;;  %v459_v8 = vld [vmem:[%s5185_s0 + $0x30] sm:$0xff] }
  0x20   :  { %3262 = vmatprep.subr.bf16.mxu0 %v4041_v0  ;;  %v462_v9 = vpack.c.bf16 %v459_v8, %v458_v7  ;;  %v3948_v7 = vld [vmem:[%s5184_s2 + $0x1e8] sm:$0xff]   ;;  %v3949_v8 = vld [vmem:[%s5184_s2 + $0x1f0] sm:$0xff]  }
  0x22   :  { %3251 = vmatmul.mubr.bf16.vlgmr.msra.gmra.mrb[0].mxu0 %v87_v11  ;;  %v3924_v11 = vld [vmem:[%s5184_s2 + $0x128] sm:$0xff]  }
  0x23   :  { %3263 = vmatpush3.bf16.msra.mxu0 %v3895_v12  ;;  %3254 = vmatprep.mubr.msk.bf16.mxu0 %vm4042_vm0, %v4041_v0  ;;  %v3925_v12 = vld [vmem:[%s5184_s2 + $0x130] sm:$0xff]  }
  0x24   :  { %3264 = vmatprep.subr.bf16.mxu0 %v4041_v0 }
  0x27   :  { %3265 = vmatpush3.bf16.msra.mxu0 %v3896_v13  ;;  %v3926_v13 = vld [vmem:[%s5184_s2 + $0x138] sm:$0xff]  }
  0x28   :  { %3266 = vmatprep.subr.bf16.mxu0 %v4041_v0 }
  0x2a   :  { %3255 = vmatmul.mubr.bf16.gmra.mrb[4].mxu0 %v88_v16  ;;  %v597_v16 = vpack.c.bf16 %v592_v15, %v591_v14  ;;  %v3952_v14 = vld [vmem:[%s5186_s11 + $0x8] sm:$0xff]   ;;  %v1004_v15 = vld [vmem:[%s5185_s0 + $0x1c] sm:$0xff] }
  0x2b   :  { %3267 = vmatpush3.bf16.msra.mxu0 %v3897_v17  ;;  %3258 = vmatprep.mubr.msk.bf16.mxu0 %vm4042_vm0, %v4041_v0  ;;  %v3927_v17 = vld [vmem:[%s5184_s2 + $0x140] sm:$0xff]  }
  0x2c   :  { %3268 = vmatprep.subr.bf16.mxu0 %v4041_v0 }
  0x2f   :  { %3269 = vmatpush3.bf16.msra.mxu0 %v3898_v18  ;;  %v3928_v18 = vld [vmem:[%s5184_s2 + $0x148] sm:$0xff]  }
  0x30   :  { %3270 = vmatprep.subr.bf16.mxu0 %v4041_v0 }
  0x32   :  { %3259 = vmatmul.mubr.bf16.gmra.mrb[8].mxu0 %v89_v21  ;;  %v48_v21 = vld [vmem:[%s5187_s1] sm:$0xff] }
  0x33   :  { %3271 = vmatpush3.bf16.msra.mxu0 %v3899_v22  ;;  %3278 = vmatprep.mubr.msk.bf16.mxu0 %vm4042_vm0, %v4041_v0  ;;  %v50_v22 = vld [vmem:[%s5187_s1 + $0x10] sm:$0xff] }
  0x34   :  { %3272 = vmatprep.subr.bf16.mxu0 %v4041_v0 }
  0x37   :  { %3273 = vmatpush3.bf16.msra.mxu0 %v3900_v23  ;;  %v4043_v23 = vmov 0  }
  0x38   :  { %3274 = vmatprep.subr.bf16.mxu0 %v4041_v0  ;;  %3885 = vset.pattern.permute.xlu0 %v4043_v23 }
  0x39   :  { %1141 = vperm.xlu0 %3885, %v48_v21   ;;  %3886 = vset.pattern.permute.xlu1 %v4043_v23  ;;  %v1007_v21 = vld [vmem:[%s5185_s0 + $0x34] sm:$0xff]  ;;  %v3955_v23 = vld [vmem:[%s5186_s11 + $0x20] sm:$0xff]  }
  0x3a   :  { %1151 = vperm.xlu1 %3886, %v50_v22  }
  0x3b   :  { %3275 = vmatpush3.bf16.msra.mxu0 %v3901_v24  ;;  %v598_v24 = vpack.c.bf16 %v594_v20, %v593_v19  ;;  %v3954_v19 = vld [vmem:[%s5186_s11 + $0x18] sm:$0xff]   ;;  %v1006_v20 = vld [vmem:[%s5185_s0 + $0x2c] sm:$0xff] }
  0x3c   :  { %3276 = vmatprep.subr.bf16.mxu0 %v4041_v0  ;;  %v1010_v22 = vpack.c.bf16 %v1007_v21, %v1006_v20 }
  0x3e   :  { %1156 = vperm.xlu1 %3886, %v51_v27   ;;  %v3959_v27 = vld [vmem:[%s5188_s5 + $0x40] sm:$0xff]  }
  0x3f   :  { %3277 = vmatpush3.bf16.msra.mxu0 %v3902_v25  ;;  %v49_v25 = vld [vmem:[%s5187_s1 + $0x8] sm:$0xff]  ;;  %3459 = vmatpush3.bf16.msra.mxu1 %v3959_v27 }
  0x40   :  { %3290 = vmatprep.subr.bf16.mxu0 %v4041_v0  ;;  %1146 = vperm.xlu0 %3885, %v49_v25   ;;  %v3957_v25 = vld [vmem:[%s5186_s11 + $0x30] sm:$0xff]  }
  0x42   :  { %3279 = vmatmul.mubr.bf16.vlgmr.msra.gmra.mrb[0].mxu0 %v62_v29  ;;  %v52_v29 = vld [vmem:[%s5187_s1 + $0x20] sm:$0xff]  ;;  %1166 = vperm.xlu1 %3886, %v53_v32   ;;  %v3965_v32 = vld [vmem:[%s5188_s5 + $0x70] sm:$0xff]  }
  0x43   :  { %3291 = vmatpush3.bf16.msra.mxu0 %v3903_v28  ;;  %3282 = vmatprep.mubr.msk.bf16.mxu0 %vm4042_vm0, %v4041_v0  ;;  %v3930_v28 = vld [vmem:[%s5184_s2 + $0x158] sm:$0xff]  }
  0x44   :  { %3292 = vmatprep.subr.bf16.mxu0 %v4041_v0  ;;  %1161 = vperm.xlu0 %3885, %v52_v29   ;;  %v3960_v29 = vld [vmem:[%s5188_s5 + $0x48] sm:$0xff]  }
  0x47   :  { %3293 = vmatpush3.bf16.msra.mxu0 %v3904_v30  ;;  %v595_v30 = vld [vmem:[%s5185_s0 + $0x29] sm:$0xff] }
  0x48   :  { %3294 = vmatprep.subr.bf16.mxu0 %v4041_v0 }
  0x4a   :  { %3283 = vmatmul.mubr.bf16.gmra.mrb[4].mxu0 %v63_v33  ;;  %v599_v33 = vpack.c.bf16 %v596_v31, %v595_v30  ;;  %v3963_v30 = vld [vmem:[%s5188_s5 + $0x60] sm:$0xff]   ;;  %v3964_v31 = vld [vmem:[%s5188_s5 + $0x68] sm:$0xff]  }
  0x4b   :  { %3295 = vmatpush3.bf16.msra.mxu0 %v3905_v34  ;;  %3286 = vmatprep.mubr.msk.bf16.mxu0 %vm4042_vm0, %v4041_v0  ;;  %v3931_v34 = vld [vmem:[%s5184_s2 + $0x160] sm:$0xff]  }
  0x4c   :  { %3296 = vmatprep.subr.bf16.mxu0 %v4041_v0 }
  0x4f   :  { %3297 = vmatpush3.bf16.msra.mxu0 %v3906_v35  ;;  %v3932_v35 = vld [vmem:[%s5184_s2 + $0x168] sm:$0xff]  }
  0x50   :  { %3298 = vmatprep.subr.bf16.mxu0 %v4041_v0 }
  0x52   :  { %3287 = vmatmul.mubr.bf16.gmra.mrb[8].mxu0 %v64_v38  ;;  %v728_v38 = vld [vmem:[%s5185_s0 + $0xa] sm:$0xff] }
  0x53   :  { %3299 = vmatpush3.bf16.msra.mxu0 %v3907_v39  ;;  %3306 = vmatprep.mubr.msk.bf16.mxu0 %vm4042_vm0, %v4041_v0  ;;  %v729_v39 = vld [vmem:[%s5185_s0 + $0x12] sm:$0xff] }
  0x54   :  { %3300 = vmatprep.subr.bf16.mxu0 %v4041_v0 }
  0x57   :  { %3301 = vmatpush3.bf16.msra.mxu0 %v3908_v40  ;;  %v734_v40 = vpack.c.bf16 %v729_v39, %v728_v38 }
  0x58   :  { %3302 = vmatprep.subr.bf16.mxu0 %v4041_v0 }
  0x5b   :  { %3303 = vmatpush3.bf16.msra.mxu0 %v3909_v41  ;;  %v3935_v41 = vld [vmem:[%s5184_s2 + $0x180] sm:$0xff]  }
  0x5c   :  { %3304 = vmatprep.subr.bf16.mxu0 %v4041_v0 }
  0x5f   :  { %3305 = vmatpush3.bf16.msra.mxu0 %v3910_v42  ;;  %v3936_v42 = vld [vmem:[%s5184_s2 + $0x188] sm:$0xff]  }
  0x60   :  { %3318 = vmatprep.subr.bf16.mxu0 %v4041_v0 }
  0x62   :  { %3307 = vmatmul.mubr.bf16.vlgmr.msra.gmra.mrb[0].mxu0 %v323_v45  ;;  %v735_v45 = vpack.c.bf16 %v731_v44, %v730_v43 }
  0x63   :  { %3319 = vmatpush3.bf16.msra.mxu0 %v3911_v46  ;;  %3310 = vmatprep.mubr.msk.bf16.mxu0 %vm4042_vm0, %v4041_v0  ;;  %v3937_v46 = vld [vmem:[%s5184_s2 + $0x190] sm:$0xff]  }
  0x64   :  { %3320 = vmatprep.subr.bf16.mxu0 %v4041_v0 }
  0x67   :  { %3321 = vmatpush3.bf16.msra.mxu0 %v3912_v47  ;;  %v3938_v47 = vld [vmem:[%s5184_s2 + $0x198] sm:$0xff]  }
  0x68   :  { %3322 = vmatprep.subr.bf16.mxu0 %v4041_v0 }
  0x6a   :  { %3311 = vmatmul.mubr.bf16.gmra.mrb[4].mxu0 %v324_v50  ;;  %v736_v50 = vpack.c.bf16 %v733_v49, %v732_v48 }
  0x6b   :  { %3323 = vmatpush3.bf16.msra.mxu0 %v3913_v51  ;;  %3314 = vmatprep.mubr.msk.bf16.mxu0 %vm4042_vm0, %v4041_v0  ;;  %v3939_v51 = vld [vmem:[%s5184_s2 + $0x1a0] sm:$0xff]  }
  0x6c   :  { %3324 = vmatprep.subr.bf16.mxu0 %v4041_v0 }
  0x6f   :  { %3325 = vmatpush3.bf16.msra.mxu0 %v3914_v52  ;;  %v3940_v52 = vld [vmem:[%s5184_s2 + $0x1a8] sm:$0xff]  }
  0x70   :  { %3326 = vmatprep.subr.bf16.mxu0 %v4041_v0 }
  0x72   :  { %3315 = vmatmul.mubr.bf16.gmra.mrb[8].mxu0 %v325_v55  ;;  %v865_v55 = vld [vmem:[%s5185_s0 + $0xb] sm:$0xff] }
  0x73   :  { %3327 = vmatpush3.bf16.msra.mxu0 %v3915_v56  ;;  %3334 = vmatprep.mubr.msk.bf16.mxu0 %vm4042_vm0, %v4041_v0  ;;  %v866_v56 = vld [vmem:[%s5185_s0 + $0x13] sm:$0xff] }
  0x74   :  { %3328 = vmatprep.subr.bf16.mxu0 %v4041_v0 }
  0x77   :  { %3329 = vmatpush3.bf16.msra.mxu0 %v3916_v57  ;;  %v871_v57 = vpack.c.bf16 %v866_v56, %v865_v55 }
  0x78   :  { %3330 = vmatprep.subr.bf16.mxu0 %v4041_v0 }
  0x7b   :  { %3331 = vmatpush3.bf16.msra.mxu0 %v3917_v58  ;;  %v3943_v58 = vld [vmem:[%s5184_s2 + $0x1c0] sm:$0xff]  }
  0x7c   :  { %3332 = vmatprep.subr.bf16.mxu0 %v4041_v0 }
  0x7f   :  { %3333 = vmatpush3.bf16.msra.mxu0 %v3918_v59  ;;  %v3944_v59 = vld [vmem:[%s5184_s2 + $0x1c8] sm:$0xff]  }
  0x80   :  { %3346 = vmatprep.subr.bf16.mxu0 %v4041_v0 }
  0x82   :  { %3335 = vmatmul.mubr.bf16.vlgmr.msra.gmra.mrb[0].mxu0 %v4332_v62 }
  0x83   :  { %3347 = vmatpush3.bf16.msra.mxu0 %v3919_v63  ;;  %3338 = vmatprep.mubr.msk.bf16.mxu0 %vm4042_vm0, %v4041_v0  ;;  %v872_v63 = vpack.c.bf16 %v868_v61, %v867_v60 }
  0x84   :  { %3348 = vmatprep.subr.bf16.mxu0 %v4041_v0 }
  0x87   :  { %3349 = vmatpush3.bf16.msra.mxu0 %v3920_v1  ;;  %v3945_v1 = vld [vmem:[%s5184_s2 + $0x1d0] sm:$0xff]  }
  0x88   :  { %3350 = vmatprep.subr.bf16.mxu0 %v4041_v0 }
  0x8a   :  { %3339 = vmatmul.mubr.bf16.gmra.mrb[4].mxu0 %v461_v4  ;;  %v870_v4 = vld [vmem:[%s5185_s0 + $0x33] sm:$0xff] }
  0x8b   :  { %3351 = vmatpush3.bf16.msra.mxu0 %v3921_v5  ;;  %3342 = vmatprep.mubr.msk.bf16.mxu0 %vm4042_vm0, %v4041_v0  ;;  %v873_v5 = vpack.c.bf16 %v870_v4, %v869_v3 }
  0x8c   :  { %3352 = vmatprep.subr.bf16.mxu0 %v4041_v0 }
  0x8f   :  { %3353 = vmatpush3.bf16.msra.mxu0 %v3922_v6  ;;  %v3947_v6 = vld [vmem:[%s5184_s2 + $0x1e0] sm:$0xff]  }
  0x90   :  { %3354 = vmatprep.subr.bf16.mxu0 %v4041_v0 }
  0x92   :  { %3343 = vmatmul.mubr.bf16.gmra.mrb[8].mxu0 %v462_v9  ;;  %v3950_v9 = vld [vmem:[%s5184_s2 + $0x1f8] sm:$0xff]  }
  0x93   :  { %3355 = vmatpush3.bf16.msra.mxu0 %v3923_v10  ;;  %3362 = vmatprep.mubr.msk.bf16.mxu0 %vm4042_vm0, %v4041_v0  ;;  %v1002_v10 = vld [vmem:[%s5185_s0 + $0xc] sm:$0xff] }
  0x94   :  { %3356 = vmatprep.subr.bf16.mxu0 %v4041_v0 }
  0x97   :  { %3357 = vmatpush3.bf16.msra.mxu0 %v3924_v11  ;;  %v1003_v11 = vld [vmem:[%s5185_s0 + $0x14] sm:$0xff] }
  0x98   :  { %3358 = vmatprep.subr.bf16.mxu0 %v4041_v0 }
  0x9b   :  { %3359 = vmatpush3.bf16.msra.mxu0 %v3925_v12  ;;  %v1008_v12 = vpack.c.bf16 %v1003_v11, %v1002_v10 }
  0x9c   :  { %3360 = vmatprep.subr.bf16.mxu0 %v4041_v0 }
  0x9f   :  { %3361 = vmatpush3.bf16.msra.mxu0 %v3926_v13  ;;  %v3951_v13 = vld [vmem:[%s5186_s11] sm:$0xff]  }
  0xa0   :  { %3374 = vmatprep.subr.bf16.mxu0 %v4041_v0 }
  0xa2   :  { %3363 = vmatmul.mubr.bf16.vlgmr.msra.gmra.mrb[0].mxu0 %v597_v16  ;;  %v1005_v16 = vld [vmem:[%s5185_s0 + $0x24] sm:$0xff] }
  0xa3   :  { %3375 = vmatpush3.bf16.msra.mxu0 %v3927_v17  ;;  %3366 = vmatprep.mubr.msk.bf16.mxu0 %vm4042_vm0, %v4041_v0  ;;  %v1009_v17 = vpack.c.bf16 %v1005_v16, %v1004_v15 }
  0xa4   :  { %3376 = vmatprep.subr.bf16.mxu0 %v4041_v0 }
  0xa7   :  { %3377 = vmatpush3.bf16.msra.mxu0 %v3928_v18  ;;  %v3953_v18 = vld [vmem:[%s5186_s11 + $0x10] sm:$0xff]  }
  0xa8   :  { %3378 = vmatprep.subr.bf16.mxu0 %v4041_v0 }
  0xaa   :  { %3367 = vmatmul.mubr.bf16.gmra.mrb[4].mxu0 %v598_v24  ;;  %v3956_v24 = vld [vmem:[%s5186_s11 + $0x28] sm:$0xff]  }
  0xab   :  { %3379 = vmatpush3.bf16.msra.mxu0 %v3929_v26  ;;  %3370 = vmatprep.mubr.msk.bf16.mxu0 %vm4042_vm0, %v4041_v0  ;;  %v3958_v26 = vld [vmem:[%s5186_s11 + $0x38] sm:$0xff]  }
  0xac   :  { %3380 = vmatprep.subr.bf16.mxu0 %v4041_v0 }
  0xaf   :  { %3381 = vmatpush3.bf16.msra.mxu0 %v3930_v28  ;;  %v4631_v28 = vld [vmem:[#allocation2] sm:$0xff] }
  0xb0   :  { %3382 = vmatprep.subr.bf16.mxu0 %v4041_v0  ;;  %3460 = vmatprep.subr.bf16.mxu1 %v4631_v28 }
  0xb1   :  { %3461 = vmatpush3.bf16.msra.mxu1 %v3960_v29 }
  0xb2   :  { %3371 = vmatmul.mubr.bf16.gmra.mrb[8].mxu0 %v599_v33  ;;  %3462 = vmatprep.subr.bf16.mxu1 %v4631_v28  ;;  %v3966_v33 = vld [vmem:[%s5188_s5 + $0x78] sm:$0xff]  }
  0xb3   :  { %3383 = vmatpush3.bf16.msra.mxu0 %v3931_v34  ;;  %3390 = vmatprep.mubr.msk.bf16.mxu0 %vm4042_vm0, %v4041_v0 }
  0xb4   :  { %3384 = vmatprep.subr.bf16.mxu0 %v4041_v0 }
  0xb7   :  { %3385 = vmatpush3.bf16.msra.mxu0 %v3932_v35 }
  0xb8   :  { %3386 = vmatprep.subr.bf16.mxu0 %v4041_v0  ;;  %v4662_v34 = vpop.permute.xlu0 %1141 }
  0xbb   :  { %3387 = vmatpush3.bf16.msra.mxu0 %v3933_v36 }
  0xbc   :  { %3388 = vmatprep.subr.bf16.mxu0 %v4041_v0 }
  0xbf   :  { %3389 = vmatpush3.bf16.msra.mxu0 %v3934_v37  ;;  %v4666_v36 = vpop.permute.xlu0 %1146 }
  0xc0   :  { %3402 = vmatprep.subr.bf16.mxu0 %v4041_v0 }
  0xc2   :  { %3391 = vmatmul.mubr.bf16.vlgmr.msra.gmra.mrb[0].mxu0 %v734_v40 }
  0xc3   :  { %3403 = vmatpush3.bf16.msra.mxu0 %v3935_v41  ;;  %3394 = vmatprep.mubr.msk.bf16.mxu0 %vm4042_vm0, %v4041_v0  ;;  %v4686_v60 = vpop.permute.xlu0 %1161 }
  0xc4   :  { %3404 = vmatprep.subr.bf16.mxu0 %v4041_v0 }
  0xc7   :  { %3405 = vmatpush3.bf16.msra.mxu0 %v3936_v42  ;;  %v4674_v42 = vpop.permute.xlu1 %1151 }
  0xc8   :  { %3406 = vmatprep.subr.bf16.mxu0 %v4041_v0 }
  0xca   :  { %3395 = vmatmul.mubr.bf16.gmra.mrb[4].mxu0 %v735_v45 }
  0xcb   :  { %3407 = vmatpush3.bf16.msra.mxu0 %v3937_v46  ;;  %3398 = vmatprep.mubr.msk.bf16.mxu0 %vm4042_vm0, %v4041_v0 }
  0xcc   :  { %3408 = vmatprep.subr.bf16.mxu0 %v4041_v0 }
  0xcf   :  { %3409 = vmatpush3.bf16.msra.mxu0 %v3938_v47 }
  0xd0   :  { %3410 = vmatprep.subr.bf16.mxu0 %v4041_v0 }
  0xd2   :  { %3399 = vmatmul.mubr.bf16.gmra.mrb[8].mxu0 %v736_v50  ;;  %v4680_v50 = vpop.permute.xlu1 %1156 }
  0xd3   :  { %3411 = vmatpush3.bf16.msra.mxu0 %v3939_v51  ;;  %3418 = vmatprep.mubr.msk.bf16.mxu0 %vm4042_vm0, %v4041_v0 }
  0xd4   :  { %3412 = vmatprep.subr.bf16.mxu0 %v4041_v0 }
  0xd7   :  { %3413 = vmatpush3.bf16.msra.mxu0 %v3940_v52 }
  0xd8   :  { %3414 = vmatprep.subr.bf16.mxu0 %v4041_v0 }
  0xdb   :  { %3415 = vmatpush3.bf16.msra.mxu0 %v3941_v53 }
  0xdc   :  { %3416 = vmatprep.subr.bf16.mxu0 %v4041_v0 }
  0xdf   :  { %3417 = vmatpush3.bf16.msra.mxu0 %v3942_v54 }
  0xe0   :  { %3430 = vmatprep.subr.bf16.mxu0 %v4041_v0 }
  0xe2   :  { %3419 = vmatmul.mubr.bf16.vlgmr.msra.gmra.mrb[0].mxu0 %v871_v57 }
  0xe3   :  { %3431 = vmatpush3.bf16.msra.mxu0 %v3943_v58  ;;  %3422 = vmatprep.mubr.msk.bf16.mxu0 %vm4042_vm0, %v4041_v0 }
  0xe4   :  { %3432 = vmatprep.subr.bf16.mxu0 %v4041_v0 }
  0xe7   :  { %3433 = vmatpush3.bf16.msra.mxu0 %v3944_v59 }
  0xe8   :  { %3434 = vmatprep.subr.bf16.mxu0 %v4041_v0 }
  0xea   :  { %3423 = vmatmul.mubr.bf16.gmra.mrb[4].mxu0 %v872_v63 }
  0xeb   :  { %3435 = vmatpush3.bf16.msra.mxu0 %v3945_v1  ;;  %3426 = vmatprep.mubr.msk.bf16.mxu0 %vm4042_vm0, %v4041_v0 }
  0xec   :  { %3436 = vmatprep.subr.bf16.mxu0 %v4041_v0 }
  0xef   :  { %3437 = vmatpush3.bf16.msra.mxu0 %v3946_v2  ;;  %v4689_v2 = vpop.permute.xlu1 %1166 }
  0xf0   :  { %3438 = vmatprep.subr.bf16.mxu0 %v4041_v0 }
  0xf2   :  { %3427 = vmatmul.mubr.bf16.gmra.mrb[8].mxu0 %v873_v5 }
  0xf3   :  { %3439 = vmatpush3.bf16.msra.mxu0 %v3947_v6  ;;  %3446 = vmatprep.mubr.msk.bf16.mxu0 %vm4042_vm0, %v4041_v0 }
  0xf4   :  { %3440 = vmatprep.subr.bf16.mxu0 %v4041_v0 }
  0xf7   :  { %3441 = vmatpush3.bf16.msra.mxu0 %v3948_v7 }
  0xf8   :  { %3442 = vmatprep.subr.bf16.mxu0 %v4041_v0 }
  0xfb   :  { %3443 = vmatpush3.bf16.msra.mxu0 %v3949_v8 }
  0xfc   :  { %3444 = vmatprep.subr.bf16.mxu0 %v4041_v0 }
  0xff   :  { %3445 = vmatpush3.bf16.msra.mxu0 %v3950_v9 }
 0x100   :  { %3682 = vmatprep.subr.bf16.mxu0 %v4041_v0 }
 0x102   :  { %3447 = vmatmul.mubr.bf16.vlgmr.msra.gmra.mrb[0].mxu0 %v1008_v12 }
 0x103   :  { %3683 = vmatpush3.bf16.msra.mxu0 %v3951_v13  ;;  %3450 = vmatprep.mubr.msk.bf16.mxu0 %vm4042_vm0, %v4041_v0 }
 0x104   :  { %3684 = vmatprep.subr.bf16.mxu0 %v4041_v0 }
 0x107   :  { %3685 = vmatpush3.bf16.msra.mxu0 %v3952_v14 }
 0x108   :  { %3686 = vmatprep.subr.bf16.mxu0 %v4041_v0 }
 0x10a   :  { %3451 = vmatmul.mubr.bf16.gmra.mrb[4].mxu0 %v1009_v17 }
 0x10b   :  { %3687 = vmatpush3.bf16.msra.mxu0 %v3953_v18  ;;  %3454 = vmatprep.mubr.msk.bf16.mxu0 %vm4042_vm0, %v4041_v0 }
 0x10c   :  { %3688 = vmatprep.subr.bf16.mxu0 %v4041_v0 }
 0x10f   :  { %3689 = vmatpush3.bf16.msra.mxu0 %v3954_v19 }
 0x110   :  { %3690 = vmatprep.subr.bf16.mxu0 %v4041_v0 }
 0x112   :  { %3455 = vmatmul.mubr.bf16.gmra.mrb[8].mxu0 %v1010_v22 }
 0x113   :  { %3691 = vmatpush3.bf16.msra.mxu0 %v3955_v23  ;;  %3698 = vmatprep.mubr.msk.bf16.mxu0 %vm4042_vm0, %v4041_v0 }
 0x114   :  { %3692 = vmatprep.subr.bf16.mxu0 %v4041_v0 }
 0x117   :  { %3693 = vmatpush3.bf16.msra.mxu0 %v3956_v24 }
 0x118   :  { %3694 = vmatprep.subr.bf16.mxu0 %v4041_v0 }
 0x11b   :  { %3695 = vmatpush3.bf16.msra.mxu0 %v3957_v25 }
 0x11c   :  { %3696 = vmatprep.subr.bf16.mxu0 %v4041_v0  ;;  %v3961_v0 = vld [vmem:[%s5188_s5 + $0x50] sm:$0xff]  }
 0x11d   :  { %3463 = vmatpush3.bf16.msra.mxu1 %v3961_v0 }
 0x11e   :  { %3464 = vmatprep.subr.bf16.mxu1 %v4631_v28 }
 0x11f   :  { %3697 = vmatpush3.bf16.msra.mxu0 %v3958_v26 }
 0x122   :  { %3699 = vmatmul.mubr.bf16.vlgmr.msra.gmra.mrb[12].mxu0 %v4332_v62  ;;  %v3962_v62 = vld [vmem:[%s5188_s5 + $0x58] sm:$0xff]  }
 0x123   :  { %3465 = vmatpush3.bf16.msra.mxu1 %v3962_v62 }
 0x124   :  { %3466 = vmatprep.subr.bf16.mxu1 %v4631_v28 }
 0x127   :  { %3467 = vmatpush3.bf16.msra.mxu1 %v3963_v30 }
 0x128   :  { %3468 = vmatprep.subr.bf16.mxu1 %v4631_v28 }
 0x12b   :  { %3469 = vmatpush3.bf16.msra.mxu1 %v3964_v31 }
 0x12c   :  { %3470 = vmatprep.subr.bf16.mxu1 %v4631_v28 }
 0x12f   :  { %3471 = vmatpush3.bf16.msra.mxu1 %v3965_v32 }
 0x130   :  { %3472 = vmatprep.subr.bf16.mxu1 %v4631_v28 }
 0x133   :  { %3473 = vmatpush3.bf16.msra.mxu1 %v3966_v33 }
 0x134   :  { %3486 = vmatprep.subr.bf16.mxu1 %v4631_v28 }
 0x1d5   :  { %v4664_v35 = vpop.f32.mrb[0].mxu0 }
 0x1d6   :  { %v1169_v37 = vmul.f32 %v4662_v34, %v4664_v35  ;;  %v3448_v38 = vpop.f32.mrb[1].mxu0 }
 0x1d7   :  { %v4670_v39 = vpop.f32.mrb[2].mxu0 }
 0x1d8   :  { %v1170_v40 = vmul.f32 %v4666_v36, %v4670_v39  ;;  %v3449_v41 = vpop.f32.mrb[3].mxu0  ;;  %v1186_v43 = vmul.f32 %v1169_v37, %v1169_v37 }
 0x1da   :  { %v1175_v44 = vadd.f32 %v1170_v40, %v1169_v37  ;;  %v1187_v45 = vmul.f32 %v1170_v40, %v1170_v40 }
 0x1dc   :  { %v1192_v46 = vadd.f32 %v1187_v45, %v1186_v43  ;;  %v1215_v43 = vlaneseq  ;;  %v1207_v45 = vld [vmem:[%s5189_s3] sm:$0x1] }
 0x1dd   :  { %v4676_v47 = vpop.f32.mrb[4].mxu0 }
 0x1de   :  { %v1171_v48 = vmul.f32 %v4674_v42, %v4676_v47  ;;  %v3452_v49 = vpop.f32.mrb[5].mxu0 }
 0x1df   :  { %v4682_v51 = vpop.f32.mrb[6].mxu0 }
 0x1e0   :  { %v1176_v52 = vadd.f32 %v1175_v44, %v1171_v48  ;;  %v1188_v53 = vmul.f32 %v1171_v48, %v1171_v48  ;;  %v1172_v54 = vmul.f32 %v4680_v50, %v4682_v51  ;;  %v3453_v55 = vpop.f32.mrb[7].mxu0  ;;  %v1216_v44 = vshrl.u32 %v1215_v43, 7  ;;  %v3973_v43 = vld [vmem:[%s5188_s5 + $0x30] sm:$0xff]  }
 0x1e2   :  { %v1193_v56 = vadd.f32 %v1192_v46, %v1188_v53  ;;  %v1177_v57 = vadd.f32 %v1176_v52, %v1172_v54  ;;  %v1189_v58 = vmul.f32 %v1172_v54, %v1172_v54  ;;  %v4707_v46 = vsub.s32 0, %v1216_v44  ;;  %v1211_v52 = vld [vmem:[%s5190_s4] sm:$0x1]  ;;  %v3974_v44 = vld [vmem:[%s5188_s5 + $0x38] sm:$0xff]  }
 0x1e4   :  { %v1194_v59 = vadd.f32 %v1193_v56, %v1189_v58 }
 0x1e5   :  { %v1126_v61 = vpop.f32.mrb[8].mxu0 }
 0x1e6   :  { %v1173_v63 = vmul.f32 %v4686_v60, %v1126_v61  ;;  %v3456_v1 = vpop.f32.mrb[9].mxu0 }
 0x1e7   :  { %v1129_v3 = vpop.f32.mrb[10].mxu0 }
 0x1e8   :  { %v1178_v4 = vadd.f32 %v1177_v57, %v1173_v63  ;;  %v1190_v5 = vmul.f32 %v1173_v63, %v1173_v63  ;;  %v1174_v6 = vmul.f32 %v4689_v2, %v1129_v3  ;;  %v3457_v7 = vpop.f32.mrb[11].mxu0 }
 0x1ea   :  { %v1195_v8 = vadd.f32 %v1194_v59, %v1190_v5  ;;  %v1179_v9 = vadd.f32 %v1178_v4, %v1174_v6  ;;  %v1191_v10 = vmul.f32 %v1174_v6, %v1174_v6 }
 0x1ec   :  { %v1180_v11 = vrot.slane %v1179_v9, 4  ;;  %v1196_v12 = vadd.f32 %v1195_v8, %v1191_v10 }
 0x1ee   :  { %v1181_v13 = vadd.f32 %v1180_v11, %v1179_v9  ;;  %v1197_v14 = vrot.slane %v1196_v12, 4 }
 0x1f0   :  { %v1182_v15 = vrot.slane %v1181_v13, 2  ;;  %v1198_v16 = vadd.f32 %v1197_v14, %v1196_v12 }
 0x1f2   :  { %v1183_v17 = vadd.f32 %v1182_v15, %v1181_v13  ;;  %v1199_v18 = vrot.slane %v1198_v16, 2 }
 0x1f4   :  { %v1184_v19 = vrot.slane %v1183_v17, 1  ;;  %v1200_v20 = vadd.f32 %v1199_v18, %v1198_v16 }
 0x1f5   :  { %v4692_v21 = vpop.f32.mrb[12].mxu0 }
 0x1f6   :  { %v1185_v22 = vadd.f32 %v1184_v19, %v1183_v17  ;;  %v1201_v23 = vrot.slane %v1200_v20, 1  ;;  %v2618_v24 = vmul.f32 %v4692_v21, %v4662_v34  ;;  %v3700_v25 = vpop.f32.mrb[13].mxu0 }
 0x1f7   :  { %v4696_v26 = vpop.f32.mrb[14].mxu0  ;;  %v3968_v25 = vld [vmem:[%s5188_s5 + $0x8] sm:$0xff]  }
 0x1f8   :  { %v1202_v27 = vadd.f32 %v1201_v23, %v1200_v20  ;;  %v1203_v29 = vmul.f32 0.03125, %v1185_v22  ;;  %v2619_v0 = vmul.f32 %v4696_v26, %v4666_v36  ;;  %v3701_v62 = vpop.f32.mrb[15].mxu0  ;;  %v2635_v30 = vmul.f32 %v2618_v24, %v2618_v24  ;;  %v3967_v23 = vld [vmem:[%s5188_s5] sm:$0xff]  }
 0x1fa   :  { %v1204_v31 = vmul.f32 0.03125, %v1202_v27  ;;  %v1205_v32 = vmul.f32 %v1203_v29, %v1203_v29  ;;  %v4700_v33 = vadd.f32 %v2619_v0, %v2618_v24  ;;  %v2636_v37 = vmul.f32 %v2619_v0, %v2619_v0  ;;  %v3969_v0 = vld [vmem:[%s5188_s5 + $0x10] sm:$0xff]  }
 0x1fc   :  { %v1206_v38 = vsub.f32 %v1204_v31, %v1205_v32  ;;  %v4702_v40 = vadd.f32 %v2636_v37, %v2635_v30  ;;  %v3970_v30 = vld [vmem:[%s5188_s5 + $0x18] sm:$0xff]   ;;  %v3971_v37 = vld [vmem:[%s5188_s5 + $0x20] sm:$0xff]  }
 0x1fe   :  { %v1208_v41 = vadd.f32 1e-05, %v1206_v38 }
 0x200   :  { %4023 = vrsqrt.f32 %v1208_v41  ;;  %v3972_v41 = vld [vmem:[%s5188_s5 + $0x28] sm:$0xff]  }
 0x20a   :  { %v4024_v48 = vpop.eup %4023 }
 0x20b   :  { %v1210_v49 = vmul.f32 %v4024_v48, %v1207_v45 }
 0x20d   :  { %v1212_v53 = vmul.f32 %v1210_v49, %v1203_v29  ;;  %v1218_v54 = vrot.slane %v1210_v49, %v4707_v46  ;;  %v3975_v49 = vld [vmem:[%s5188_s5 + $0x80] sm:$0xff]  }
 0x20f   :  { %v1213_v55 = vsub.f32 %v1211_v52, %v1212_v53  ;;  %v1220_v56 = vmul.f32 %v1218_v54, %v4664_v35  ;;  %v1221_v57 = vmul.f32 %v1218_v54, %v4670_v39  ;;  %v1222_v58 = vmul.f32 %v1218_v54, %v4676_v47  ;;  %v3976_v53 = vld [vmem:[%s5188_s5 + $0x88] sm:$0xff]  }
 0x210   :  { %v1223_v59 = vmul.f32 %v1218_v54, %v4682_v51  ;;  %v1224_v63 = vmul.f32 %v1218_v54, %v1126_v61  ;;  %v1225_v1 = vmul.f32 %v1218_v54, %v1129_v3 }
 0x211   :  { %v1230_v4 = vrot.slane %v1213_v55, %v4707_v46 }
 0x213   :  { %v1232_v5 = vadd.f32 %v1230_v4, %v1220_v56  ;;  %v1233_v6 = vadd.f32 %v1230_v4, %v1221_v57  ;;  %v1234_v7 = vadd.f32 %v1230_v4, %v1222_v58  ;;  %v1235_v8 = vadd.f32 %v1230_v4, %v1223_v59  ;;  %v3977_v56 = vld [vmem:[%s5188_s5 + $0x90] sm:$0xff]   ;;  %v3978_v58 = vld [vmem:[%s5188_s5 + $0x98] sm:$0xff]  }
 0x214   :  { %v1236_v9 = vadd.f32 %v1230_v4, %v1224_v63  ;;  %v1237_v10 = vadd.f32 %v1230_v4, %v1225_v1  ;;  %v3979_v1 = vld [vmem:[%s5188_s5 + $0xa0] sm:$0xff]  }
 0x215   :  { %v1238_v11 = vmax.f32 %v1232_v5, 0.0  ;;  %v1239_v12 = vmax.f32 %v1233_v6, 0.0  ;;  %v1240_v13 = vmax.f32 %v1234_v7, 0.0  ;;  %v1241_v35 = vmax.f32 %v1235_v8, 0.0  ;;  %v3980_v5 = vld [vmem:[%s5188_s5 + $0xa8] sm:$0xff]   ;;  %v3981_v6 = vld [vmem:[%s5188_s5 + $0xb0] sm:$0xff]  }
 0x216   :  { %v1242_v14 = vmax.f32 %v1236_v9, 0.0  ;;  %v1243_v39 = vmax.f32 %v1237_v10, 0.0  ;;  %v3982_v7 = vld [vmem:[%s5188_s5 + $0xb8] sm:$0xff]   ;;  %v3983_v8 = vld [vmem:[%s5188_s5 + $0xc0] sm:$0xff]   ;;  %v3984_v9 = vld [vmem:[%s5188_s5 + $0xc8] sm:$0xff]  }
 0x217   :  { %v4719_v47 = vmul.f32 %v1238_v11, %v4662_v34  ;;  %v4722_v51 = vmul.f32 %v1239_v12, %v4666_v36  ;;  %v4725_v61 = vmul.f32 %v1240_v13, %v4674_v42  ;;  %v4728_v3 = vmul.f32 %v1241_v35, %v4680_v50  ;;  %v3985_v10 = vld [vmem:[%s5188_s5 + $0xd0] sm:$0xff]   ;;  %v3986_v11 = vld [vmem:[%s5188_s5 + $0xd8] sm:$0xff]   ;;  %v3987_v12 = vld [vmem:[%s5188_s5 + $0xe0] sm:$0xff]  }
 0x218   :  { %v4731_v15 = vmul.f32 %v1242_v14, %v4686_v60  ;;  %v4734_v16 = vmul.f32 %v1243_v39, %v4689_v2  ;;  %v3988_v13 = vld [vmem:[%s5188_s5 + $0xe8] sm:$0xff]   ;;  %v3989_v35 = vld [vmem:[%s5188_s5 + $0xf0] sm:$0xff]   ;;  %v3990_v14 = vld [vmem:[%s5188_s5 + $0xf8] sm:$0xff]  }
 0x219   :  { %1251 = vst [vmem:[#allocation2 + $0x10] sm:$0xff] %v4722_v51  ;;  %1252 = vst [vmem:[#allocation2 + $0x18] sm:$0xff] %v4725_v61  ;;  %v1523_v17 = vpack.c.bf16 %v4722_v51, %v4719_v47  ;;  %v1524_v18 = vpack.c.bf16 %v4728_v3, %v4725_v61  ;;  %v3991_v51 = vld [vmem:[%s5188_s5 + $0x100] sm:$0xff]  }
 0x21a   :  { %1253 = vst [vmem:[#allocation2 + $0x20] sm:$0xff] %v4728_v3  ;;  %1250 = vst [vmem:[#allocation2 + $0x8] sm:$0xff] %v4719_v47  ;;  %v1525_v19 = vpack.c.bf16 %v4734_v16, %v4731_v15  ;;  %v3992_v3 = vld [vmem:[%s5188_s5 + $0x108] sm:$0xff]  }
 0x21b   :  { %1254 = vst [vmem:[#allocation2 + $0x28] sm:$0xff] %v4731_v15  ;;  %1255 = vst [vmem:[#allocation2 + $0x30] sm:$0xff] %v4734_v16 }
 0x220   :  { %v1283_v27 = vld [vmem:[#allocation2 + $0x17] sm:$0xff] }
 0x221   :  { %v1281_v20 = vld [vmem:[#allocation2 + $0x7] sm:$0xff]  ;;  %v1282_v22 = vld [vmem:[#allocation2 + $0xf] sm:$0xff]  ;;  %v1284_v29 = vld [vmem:[#allocation2 + $0x1f] sm:$0xff] }
 0x222   :  { %v1287_v24 = vpack.c.bf16 %v1282_v22, %v1281_v20  ;;  %v1288_v62 = vpack.c.bf16 %v1284_v29, %v1283_v27  ;;  %v1285_v31 = vld [vmem:[#allocation2 + $0x27] sm:$0xff]  ;;  %v1286_v32 = vld [vmem:[#allocation2 + $0x2f] sm:$0xff]  ;;  %v1259_v55 = vld [vmem:[#allocation2 + $0x1e] sm:$0xff] }
 0x223   :  { %v1289_v38 = vpack.c.bf16 %v1286_v32, %v1285_v31  ;;  %v1256_v45 = vld [vmem:[#allocation2 + $0x6] sm:$0xff]  ;;  %v1257_v48 = vld [vmem:[#allocation2 + $0xe] sm:$0xff]  ;;  %v1258_v54 = vld [vmem:[#allocation2 + $0x16] sm:$0xff] }
 0x224   :  { %3475 = vmatmul.mubr.bf16.vlgmr.msra.gmra.mrb[0].mxu1 %v1287_v24  ;;  %v1262_v52 = vpack.c.bf16 %v1257_v48, %v1256_v45  ;;  %v1263_v57 = vpack.c.bf16 %v1259_v55, %v1258_v54  ;;  %v1260_v59 = vld [vmem:[#allocation2 + $0x26] sm:$0xff]  ;;  %v1261_v63 = vld [vmem:[#allocation2 + $0x2e] sm:$0xff]  ;;  %v1656_v15 = vld [vmem:[#allocation2 + $0x19] sm:$0xff] }
 0x225   :  { %3487 = vmatpush3.bf16.msra.mxu1 %v3967_v23  ;;  %3478 = vmatprep.mubr.msk.bf16.mxu1 %vm4042_vm0, %v4631_v28  ;;  %v1264_v4 = vpack.c.bf16 %v1261_v63, %v1260_v59  ;;  %v1654_v39 = vld [vmem:[#allocation2 + $0x9] sm:$0xff]  ;;  %v1655_v47 = vld [vmem:[#allocation2 + $0x11] sm:$0xff]  ;;  %v1657_v16 = vld [vmem:[#allocation2 + $0x21] sm:$0xff] }
 0x226   :  { %3488 = vmatprep.subr.bf16.mxu1 %v4631_v28  ;;  %v1660_v61 = vpack.c.bf16 %v1655_v47, %v1654_v39  ;;  %v1658_v20 = vld [vmem:[#allocation2 + $0x29] sm:$0xff]  ;;  %v1659_v22 = vld [vmem:[#allocation2 + $0x31] sm:$0xff]  ;;  %v3995_v23 = vld [vmem:[%s5188_s5 + $0x120] sm:$0xff]  }
 0x227   :  { %v1662_v24 = vpack.c.bf16 %v1659_v22, %v1658_v20  ;;  %v3997_v27 = vld [vmem:[%s5188_s5 + $0x130] sm:$0xff]   ;;  %v3998_v29 = vld [vmem:[%s5188_s5 + $0x138] sm:$0xff]   ;;  %v1794_v32 = vld [vmem:[#allocation2 + $0x22] sm:$0xff] }
 0x228   :  { %v1793_v31 = vld [vmem:[#allocation2 + $0x1a] sm:$0xff]  ;;  %v4000_v45 = vld [vmem:[%s5191_s8 + $0x48] sm:$0xff]   ;;  %v4001_v48 = vld [vmem:[%s5191_s8 + $0x50] sm:$0xff]  }
 0x229   :  { %3489 = vmatpush3.bf16.msra.mxu1 %v3968_v25  ;;  %v3996_v25 = vld [vmem:[%s5188_s5 + $0x128] sm:$0xff]   ;;  %v4005_v54 = vld [vmem:[%s5191_s8 + $0x70] sm:$0xff]   ;;  %v4006_v55 = vld [vmem:[%s5191_s8 + $0x78] sm:$0xff]  }
 0x22a   :  { %3490 = vmatprep.subr.bf16.mxu1 %v4631_v28 }
 0x22c   :  { %3479 = vmatmul.mubr.bf16.gmra.mrb[4].mxu1 %v1288_v62  ;;  %v1792_v62 = vld [vmem:[#allocation2 + $0x12] sm:$0xff] }
 0x22d   :  { %3491 = vmatpush3.bf16.msra.mxu1 %v3969_v0  ;;  %3482 = vmatprep.mubr.msk.bf16.mxu1 %vm4042_vm0, %v4631_v28  ;;  %v1791_v0 = vld [vmem:[#allocation2 + $0xa] sm:$0xff] }
 0x22e   :  { %3492 = vmatprep.subr.bf16.mxu1 %v4631_v28 }
 0x231   :  { %3493 = vmatpush3.bf16.msra.mxu1 %v3970_v30  ;;  %v1797_v30 = vpack.c.bf16 %v1792_v62, %v1791_v0 }
 0x232   :  { %3494 = vmatprep.subr.bf16.mxu1 %v4631_v28 }
 0x234   :  { %3483 = vmatmul.mubr.bf16.gmra.mrb[8].mxu1 %v1289_v38  ;;  %v1795_v38 = vld [vmem:[#allocation2 + $0x2a] sm:$0xff] }
 0x235   :  { %3495 = vmatpush3.bf16.msra.mxu1 %v3971_v37  ;;  %3502 = vmatprep.mubr.msk.bf16.mxu1 %vm4042_vm0, %v4631_v28  ;;  %v1798_v37 = vpack.c.bf16 %v1794_v32, %v1793_v31 }
 0x236   :  { %3496 = vmatprep.subr.bf16.mxu1 %v4631_v28 }
 0x239   :  { %3497 = vmatpush3.bf16.msra.mxu1 %v3972_v41  ;;  %v1796_v41 = vld [vmem:[#allocation2 + $0x32] sm:$0xff] }
 0x23a   :  { %3498 = vmatprep.subr.bf16.mxu1 %v4631_v28 }
 0x23d   :  { %3499 = vmatpush3.bf16.msra.mxu1 %v3973_v43  ;;  %v1799_v43 = vpack.c.bf16 %v1796_v41, %v1795_v38 }
 0x23e   :  { %3500 = vmatprep.subr.bf16.mxu1 %v4631_v28 }
 0x241   :  { %3501 = vmatpush3.bf16.msra.mxu1 %v3974_v44  ;;  %v3999_v44 = vld [vmem:[%s5191_s8 + $0x40] sm:$0xff]  }
 0x242   :  { %3514 = vmatprep.subr.bf16.mxu1 %v4631_v28 }
 0x244   :  { %3503 = vmatmul.mubr.bf16.vlgmr.msra.gmra.mrb[0].mxu1 %v1262_v52  ;;  %v4003_v52 = vld [vmem:[%s5191_s8 + $0x60] sm:$0xff]  }
 0x245   :  { %3515 = vmatpush3.bf16.msra.mxu1 %v3975_v49  ;;  %3506 = vmatprep.mubr.msk.bf16.mxu1 %vm4042_vm0, %v4631_v28  ;;  %v4002_v49 = vld [vmem:[%s5191_s8 + $0x58] sm:$0xff]  }
 0x246   :  { %3516 = vmatprep.subr.bf16.mxu1 %v4631_v28 }
 0x249   :  { %3517 = vmatpush3.bf16.msra.mxu1 %v3976_v53  ;;  %v4004_v53 = vld [vmem:[%s5191_s8 + $0x68] sm:$0xff]  }
 0x24a   :  { %3518 = vmatprep.subr.bf16.mxu1 %v4631_v28 }
 0x24c   :  { %3507 = vmatmul.mubr.bf16.gmra.mrb[4].mxu1 %v1263_v57 }
 0x24d   :  { %3519 = vmatpush3.bf16.msra.mxu1 %v3977_v56  ;;  %3510 = vmatprep.mubr.msk.bf16.mxu1 %vm4042_vm0, %v4631_v28 }
 0x24e   :  { %3520 = vmatprep.subr.bf16.mxu1 %v4631_v28 }
 0x251   :  { %3521 = vmatpush3.bf16.msra.mxu1 %v3978_v58 }
 0x252   :  { %3522 = vmatprep.subr.bf16.mxu1 %v4631_v28 }
 0x254   :  { %3511 = vmatmul.mubr.bf16.gmra.mrb[8].mxu1 %v1264_v4 }
 0x255   :  { %3523 = vmatpush3.bf16.msra.mxu1 %v3979_v1  ;;  %3530 = vmatprep.mubr.msk.bf16.mxu1 %vm4042_vm0, %v4631_v28 }
 0x256   :  { %3524 = vmatprep.subr.bf16.mxu1 %v4631_v28 }
 0x259   :  { %3525 = vmatpush3.bf16.msra.mxu1 %v3980_v5 }
 0x25a   :  { %3526 = vmatprep.subr.bf16.mxu1 %v4631_v28 }
 0x25d   :  { %3527 = vmatpush3.bf16.msra.mxu1 %v3981_v6 }
 0x25e   :  { %3528 = vmatprep.subr.bf16.mxu1 %v4631_v28 }
 0x261   :  { %3529 = vmatpush3.bf16.msra.mxu1 %v3982_v7 }
 0x262   :  { %3542 = vmatprep.subr.bf16.mxu1 %v4631_v28 }
 0x264   :  { %3531 = vmatmul.mubr.bf16.vlgmr.msra.gmra.mrb[0].mxu1 %v1523_v17  ;;  %v3993_v17 = vld [vmem:[%s5188_s5 + $0x110] sm:$0xff]  }
 0x265   :  { %3543 = vmatpush3.bf16.msra.mxu1 %v3983_v8  ;;  %3534 = vmatprep.mubr.msk.bf16.mxu1 %vm4042_vm0, %v4631_v28 }
 0x266   :  { %3544 = vmatprep.subr.bf16.mxu1 %v4631_v28 }
 0x269   :  { %3545 = vmatpush3.bf16.msra.mxu1 %v3984_v9 }
 0x26a   :  { %3546 = vmatprep.subr.bf16.mxu1 %v4631_v28 }
 0x26c   :  { %3535 = vmatmul.mubr.bf16.gmra.mrb[4].mxu1 %v1524_v18  ;;  %v1661_v18 = vpack.c.bf16 %v1657_v16, %v1656_v15 }
 0x26d   :  { %3547 = vmatpush3.bf16.msra.mxu1 %v3985_v10  ;;  %3538 = vmatprep.mubr.msk.bf16.mxu1 %vm4042_vm0, %v4631_v28 }
 0x26e   :  { %3548 = vmatprep.subr.bf16.mxu1 %v4631_v28 }
 0x271   :  { %3549 = vmatpush3.bf16.msra.mxu1 %v3986_v11 }
 0x272   :  { %3550 = vmatprep.subr.bf16.mxu1 %v4631_v28 }
 0x274   :  { %3539 = vmatmul.mubr.bf16.gmra.mrb[8].mxu1 %v1525_v19  ;;  %v3994_v19 = vld [vmem:[%s5188_s5 + $0x118] sm:$0xff]  }
 0x275   :  { %3551 = vmatpush3.bf16.msra.mxu1 %v3987_v12  ;;  %3558 = vmatprep.mubr.msk.bf16.mxu1 %vm4042_vm0, %v4631_v28 }
 0x276   :  { %3552 = vmatprep.subr.bf16.mxu1 %v4631_v28 }
 0x279   :  { %3553 = vmatpush3.bf16.msra.mxu1 %v3988_v13 }
 0x27a   :  { %3554 = vmatprep.subr.bf16.mxu1 %v4631_v28 }
 0x27d   :  { %3555 = vmatpush3.bf16.msra.mxu1 %v3989_v35 }
 0x27e   :  { %3556 = vmatprep.subr.bf16.mxu1 %v4631_v28 }
 0x281   :  { %3557 = vmatpush3.bf16.msra.mxu1 %v3990_v14 }
 0x282   :  { %3570 = vmatprep.subr.bf16.mxu1 %v4631_v28 }
 0x284   :  { %3559 = vmatmul.mubr.bf16.vlgmr.msra.gmra.mrb[0].mxu1 %v1660_v61 }
 0x285   :  { %3571 = vmatpush3.bf16.msra.mxu1 %v3991_v51  ;;  %3562 = vmatprep.mubr.msk.bf16.mxu1 %vm4042_vm0, %v4631_v28 }
 0x286   :  { %3572 = vmatprep.subr.bf16.mxu1 %v4631_v28 }
 0x289   :  { %3573 = vmatpush3.bf16.msra.mxu1 %v3992_v3 }
 0x28a   :  { %3574 = vmatprep.subr.bf16.mxu1 %v4631_v28 }
 0x28c   :  { %3563 = vmatmul.mubr.bf16.gmra.mrb[4].mxu1 %v1661_v18 }
 0x28d   :  { %3575 = vmatpush3.bf16.msra.mxu1 %v3993_v17  ;;  %3566 = vmatprep.mubr.msk.bf16.mxu1 %vm4042_vm0, %v4631_v28 }
 0x28e   :  { %3576 = vmatprep.subr.bf16.mxu1 %v4631_v28 }
 0x291   :  { %3577 = vmatpush3.bf16.msra.mxu1 %v3994_v19 }
 0x292   :  { %3578 = vmatprep.subr.bf16.mxu1 %v4631_v28 }
 0x294   :  { %3567 = vmatmul.mubr.bf16.gmra.mrb[8].mxu1 %v1662_v24 }
 0x295   :  { %3579 = vmatpush3.bf16.msra.mxu1 %v3995_v23  ;;  %3586 = vmatprep.mubr.msk.bf16.mxu1 %vm4042_vm0, %v4631_v28 }
 0x296   :  { %3580 = vmatprep.subr.bf16.mxu1 %v4631_v28 }
 0x299   :  { %3581 = vmatpush3.bf16.msra.mxu1 %v3996_v25 }
 0x29a   :  { %3582 = vmatprep.subr.bf16.mxu1 %v4631_v28 }
 0x29d   :  { %3583 = vmatpush3.bf16.msra.mxu1 %v3997_v27 }
 0x29e   :  { %3584 = vmatprep.subr.bf16.mxu1 %v4631_v28 }
 0x2a1   :  { %3585 = vmatpush3.bf16.msra.mxu1 %v3998_v29 }
 0x2a2   :  { %3598 = vmatprep.subr.bf16.mxu1 %v4631_v28 }
 0x2a4   :  { %3587 = vmatmul.mubr.bf16.vlgmr.msra.gmra.mrb[0].mxu1 %v1797_v30 }
 0x2a5   :  { %3590 = vmatprep.mubr.msk.bf16.mxu1 %vm4042_vm0, %v4631_v28  ;;  %3599 = vmatpush3.bf16.msra.mxu1 %v3999_v44 }
 0x2a6   :  { %3600 = vmatprep.subr.bf16.mxu1 %v4631_v28 }
 0x2a9   :  { %3601 = vmatpush3.bf16.msra.mxu1 %v4000_v45 }
 0x2aa   :  { %3602 = vmatprep.subr.bf16.mxu1 %v4631_v28 }
 0x2ac   :  { %3591 = vmatmul.mubr.bf16.gmra.mrb[4].mxu1 %v1798_v37 }
 0x2ad   :  { %3594 = vmatprep.mubr.msk.bf16.mxu1 %vm4042_vm0, %v4631_v28  ;;  %3603 = vmatpush3.bf16.msra.mxu1 %v4001_v48 }
 0x2ae   :  { %3604 = vmatprep.subr.bf16.mxu1 %v4631_v28 }
 0x2b1   :  { %3605 = vmatpush3.bf16.msra.mxu1 %v4002_v49 }
 0x2b2   :  { %3606 = vmatprep.subr.bf16.mxu1 %v4631_v28 }
 0x2b4   :  { %3595 = vmatmul.mubr.bf16.gmra.mrb[8].mxu1 %v1799_v43 }
 0x2b5   :  { %3614 = vmatprep.mubr.msk.bf16.mxu1 %vm4042_vm0, %v4631_v28  ;;  %3607 = vmatpush3.bf16.msra.mxu1 %v4003_v52 }
 0x2b6   :  { %3608 = vmatprep.subr.bf16.mxu1 %v4631_v28 }
 0x2b9   :  { %3609 = vmatpush3.bf16.msra.mxu1 %v4004_v53 }
 0x2ba   :  { %3610 = vmatprep.subr.bf16.mxu1 %v4631_v28 }
 0x2bd   :  { %3611 = vmatpush3.bf16.msra.mxu1 %v4005_v54  ;;  %v1966_v54 = vld [vmem:[%s5192_s6] sm:$0x1] }
 0x2be   :  { %3612 = vmatprep.subr.bf16.mxu1 %v4631_v28 }
 0x2c1   :  { %3613 = vmatpush3.bf16.msra.mxu1 %v4006_v55 }
 0x2c2   :  { %3626 = vmatprep.subr.bf16.mxu1 %v4631_v28 }
 0x377   :  { %v1899_v56 = vpop.f32.mrb[0].mxu1 }
 0x378   :  { %v1928_v57 = vmul.f32 %v1899_v56, %v4662_v34  ;;  %v3588_v58 = vpop.f32.mrb[1].mxu1 }
 0x379   :  { %v1902_v59 = vpop.f32.mrb[2].mxu1  ;;  %v1970_v58 = vld [vmem:[%s5193_s7] sm:$0x1] }
 0x37a   :  { %v1929_v63 = vmul.f32 %v1902_v59, %v4666_v36  ;;  %v3589_v1 = vpop.f32.mrb[3].mxu1  ;;  %v1945_v4 = vmul.f32 %v1928_v57, %v1928_v57 }
 0x37c   :  { %v1934_v5 = vadd.f32 %v1929_v63, %v1928_v57  ;;  %v1946_v6 = vmul.f32 %v1929_v63, %v1929_v63 }
 0x37e   :  { %v1951_v7 = vadd.f32 %v1946_v6, %v1945_v4 }
 0x37f   :  { %v1907_v8 = vpop.f32.mrb[4].mxu1 }
 0x380   :  { %v1930_v9 = vmul.f32 %v1907_v8, %v4674_v42  ;;  %v3592_v10 = vpop.f32.mrb[5].mxu1 }
 0x381   :  { %v1910_v11 = vpop.f32.mrb[6].mxu1 }
 0x382   :  { %v1935_v12 = vadd.f32 %v1934_v5, %v1930_v9  ;;  %v1947_v13 = vmul.f32 %v1930_v9, %v1930_v9  ;;  %v1931_v28 = vmul.f32 %v1910_v11, %v4680_v50  ;;  %v3593_v35 = vpop.f32.mrb[7].mxu1 }
 0x384   :  { %v1952_v14 = vadd.f32 %v1951_v7, %v1947_v13  ;;  %v1936_v39 = vadd.f32 %v1935_v12, %v1931_v28  ;;  %v1948_v47 = vmul.f32 %v1931_v28, %v1931_v28 }
 0x386   :  { %v1953_v51 = vadd.f32 %v1952_v14, %v1948_v47 }
 0x387   :  { %v1915_v61 = vpop.f32.mrb[8].mxu1 }
 0x388   :  { %v1932_v3 = vmul.f32 %v1915_v61, %v4686_v60  ;;  %v3596_v15 = vpop.f32.mrb[9].mxu1 }
 0x389   :  { %v1918_v16 = vpop.f32.mrb[10].mxu1 }
 0x38a   :  { %v1937_v17 = vadd.f32 %v1936_v39, %v1932_v3  ;;  %v1949_v18 = vmul.f32 %v1932_v3, %v1932_v3  ;;  %v1933_v19 = vmul.f32 %v1918_v16, %v4689_v2  ;;  %v3597_v20 = vpop.f32.mrb[11].mxu1 }
 0x38c   :  { %v1954_v22 = vadd.f32 %v1953_v51, %v1949_v18  ;;  %v1938_v23 = vadd.f32 %v1937_v17, %v1933_v19  ;;  %v1950_v24 = vmul.f32 %v1933_v19, %v1933_v19 }
 0x38e   :  { %v1939_v25 = vrot.slane %v1938_v23, 4  ;;  %v1955_v27 = vadd.f32 %v1954_v22, %v1950_v24  ;;  %v4007_v22 = vld [vmem:[%s5191_s8] sm:$0xff]  }
 0x390   :  { %v1940_v29 = vadd.f32 %v1939_v25, %v1938_v23  ;;  %v1956_v0 = vrot.slane %v1955_v27, 4 }
 0x392   :  { %v1941_v62 = vrot.slane %v1940_v29, 2  ;;  %v1957_v30 = vadd.f32 %v1956_v0, %v1955_v27  ;;  %v4008_v27 = vld [vmem:[%s5191_s8 + $0x8] sm:$0xff]   ;;  %v4009_v0 = vld [vmem:[%s5191_s8 + $0x10] sm:$0xff]  }
 0x394   :  { %v1942_v31 = vadd.f32 %v1941_v62, %v1940_v29  ;;  %v1958_v32 = vrot.slane %v1957_v30, 2  ;;  %v4973_v29 = vld [vmem:[#allocation2] sm:$0xff]  ;;  %v4010_v62 = vld [vmem:[%s5191_s8 + $0x18] sm:$0xff]  }
 0x396   :  { %v1943_v37 = vrot.slane %v1942_v31, 1  ;;  %v1959_v38 = vadd.f32 %v1958_v32, %v1957_v30  ;;  %v4011_v30 = vld [vmem:[%s5191_s8 + $0x20] sm:$0xff]   ;;  %v4013_v32 = vld [vmem:[%s5191_s8 + $0x30] sm:$0xff]  }
 0x398   :  { %v1944_v41 = vadd.f32 %v1943_v37, %v1942_v31  ;;  %v1960_v43 = vrot.slane %v1959_v38, 1  ;;  %v4012_v31 = vld [vmem:[%s5191_s8 + $0x28] sm:$0xff]   ;;  %v4014_v37 = vld [vmem:[%s5191_s8 + $0x38] sm:$0xff]  }
 0x39a   :  { %v1961_v44 = vadd.f32 %v1960_v43, %v1959_v38  ;;  %v1962_v45 = vmul.f32 0.03125, %v1944_v41  ;;  %v4015_v43 = vld [vmem:[%s5191_s8 + $0x80] sm:$0xff]  }
 0x39c   :  { %v1963_v48 = vmul.f32 0.03125, %v1961_v44  ;;  %v1964_v49 = vmul.f32 %v1962_v45, %v1962_v45 }
 0x39e   :  { %v1965_v52 = vsub.f32 %v1963_v48, %v1964_v49 }
 0x3a0   :  { %v1967_v53 = vadd.f32 1e-05, %v1965_v52  ;;  %v4017_v52 = vld [vmem:[%s5191_s8 + $0x90] sm:$0xff]  }
 0x3a2   :  { %4025 = vrsqrt.f32 %v1967_v53 }
 0x3ac   :  { %v4026_v55 = vpop.eup %4025 }
 0x3ad   :  { %v1969_v57 = vmul.f32 %v4026_v55, %v1966_v54  ;;  %v4018_v54 = vld [vmem:[%s5191_s8 + $0x98] sm:$0xff]  }
 0x3af   :  { %v1971_v63 = vmul.f32 %v1969_v57, %v1962_v45  ;;  %v1977_v1 = vrot.slane %v1969_v57, %v4707_v46  ;;  %v4016_v45 = vld [vmem:[%s5191_s8 + $0x88] sm:$0xff]  }
 0x3b1   :  { %v1972_v4 = vsub.f32 %v1970_v58, %v1971_v63  ;;  %v1979_v5 = vmul.f32 %v1977_v1, %v1899_v56  ;;  %v1980_v6 = vmul.f32 %v1977_v1, %v1902_v59  ;;  %v1981_v7 = vmul.f32 %v1977_v1, %v1907_v8  ;;  %v4019_v58 = vld [vmem:[%s5191_s8 + $0xa0] sm:$0xff]  }
 0x3b2   :  { %v1982_v9 = vmul.f32 %v1977_v1, %v1910_v11  ;;  %v1983_v10 = vmul.f32 %v1977_v1, %v1915_v61  ;;  %v1984_v12 = vmul.f32 %v1977_v1, %v1918_v16  ;;  %v4020_v1 = vld [vmem:[%s5191_s8 + $0xa8] sm:$0xff]  }
 0x3b3   :  { %v1989_v13 = vrot.slane %v1972_v4, %v4707_v46  ;;  %v4021_v4 = vld [vmem:[%s5191_s8 + $0xb0] sm:$0xff]  }
 0x3b5   :  { %v1991_v28 = vadd.f32 %v1989_v13, %v1979_v5  ;;  %v1992_v35 = vadd.f32 %v1989_v13, %v1980_v6  ;;  %v1993_v14 = vadd.f32 %v1989_v13, %v1981_v7  ;;  %v1994_v39 = vadd.f32 %v1989_v13, %v1982_v9  ;;  %v4022_v5 = vld [vmem:[%s5191_s8 + $0xb8] sm:$0xff]  }
 0x3b6   :  { %v1995_v47 = vadd.f32 %v1989_v13, %v1983_v10  ;;  %v1996_v51 = vadd.f32 %v1989_v13, %v1984_v12  ;;  %v4033_v10 = vld [vmem:[%s5186_s11] sm:$0xff]  }
 0x3b7   :  { %v1997_v3 = vmax.f32 %v1991_v28, 0.0  ;;  %v1998_v15 = vmax.f32 %v1992_v35, 0.0  ;;  %v1999_v17 = vmax.f32 %v1993_v14, 0.0  ;;  %v2000_v18 = vmax.f32 %v1994_v39, 0.0  ;;  %v4034_v28 = vld [vmem:[%s5186_s11 + $0x8] sm:$0xff]   ;;  %v4035_v14 = vld [vmem:[%s5186_s11 + $0x10] sm:$0xff]  }
 0x3b8   :  { %v2001_v19 = vmax.f32 %v1995_v47, 0.0  ;;  %v2002_v20 = vmax.f32 %v1996_v51, 0.0  ;;  %v4036_v51 = vld [vmem:[%s5186_s11 + $0x18] sm:$0xff]  }
 0x3b9   :  { %v2003_v56 = vmul.f32 %v1997_v3, %v4662_v34  ;;  %v2004_v59 = vmul.f32 %v1998_v15, %v4666_v36  ;;  %v2005_v8 = vmul.f32 %v1999_v17, %v4674_v42  ;;  %v2006_v11 = vmul.f32 %v2000_v18, %v4680_v50  ;;  %v4037_v15 = vld [vmem:[%s5186_s11 + $0x20] sm:$0xff]   ;;  %v4038_v17 = vld [vmem:[%s5186_s11 + $0x28] sm:$0xff]   ;;  %v4039_v18 = vld [vmem:[%s5186_s11 + $0x30] sm:$0xff]  }
 0x3ba   :  { %v2007_v61 = vmul.f32 %v2001_v19, %v4686_v60  ;;  %v2008_v16 = vmul.f32 %v2002_v20, %v4689_v2  ;;  %v2490_v19 = vld [vmem:[%s5185_s0 + $0x18] sm:$0xff]  ;;  %v2491_v20 = vld [vmem:[%s5185_s0 + $0x20] sm:$0xff] }
 0x3bb   :  { %2009 = vst [vmem:[#allocation2 + $0x8] sm:$0xff] %v2003_v56  ;;  %2010 = vst [vmem:[#allocation2 + $0x10] sm:$0xff] %v2004_v59  ;;  %v2046_v23 = vpack.c.bf16 %v2004_v59, %v2003_v56  ;;  %v2047_v24 = vpack.c.bf16 %v2006_v11, %v2005_v8  ;;  %v2495_v56 = vpack.c.bf16 %v2491_v20, %v2490_v19  ;;  %v4040_v59 = vld [vmem:[%s5186_s11 + $0x38] sm:$0xff]  }
 0x3bc   :  { %2011 = vst [vmem:[#allocation2 + $0x18] sm:$0xff] %v2005_v8  ;;  %2012 = vst [vmem:[#allocation2 + $0x20] sm:$0xff] %v2006_v11  ;;  %v2048_v25 = vpack.c.bf16 %v2008_v16, %v2007_v61  ;;  %v2492_v8 = vld [vmem:[%s5185_s0 + $0x28] sm:$0xff]  ;;  %v2493_v11 = vld [vmem:[%s5185_s0 + $0x30] sm:$0xff] }
 0x3bd   :  { %2013 = vst [vmem:[#allocation2 + $0x28] sm:$0xff] %v2007_v61  ;;  %2014 = vst [vmem:[#allocation2 + $0x30] sm:$0xff] %v2008_v16  ;;  %3615 = vmatmul.mubr.bf16.vlgmr.msra.gmra.mrb[12].mxu1 %v2046_v23  ;;  %v2496_v61 = vpack.c.bf16 %v2493_v11, %v2492_v8 }
 0x3be   :  { %3627 = vmatpush3.bf16.msra.mxu1 %v4007_v22  ;;  %3618 = vmatprep.mubr.msk.bf16.mxu1 %vm4042_vm0, %v4973_v29 }
 0x3bf   :  { %3628 = vmatprep.subr.bf16.mxu1 %v4973_v29 }
 0x3c2   :  { %3629 = vmatpush3.bf16.msra.mxu1 %v4008_v27  ;;  %v2015_v38 = vld [vmem:[#allocation2 + $0x7] sm:$0xff]  ;;  %v2016_v41 = vld [vmem:[#allocation2 + $0xf] sm:$0xff] }
 0x3c3   :  { %3630 = vmatprep.subr.bf16.mxu1 %v4973_v29  ;;  %v2021_v44 = vpack.c.bf16 %v2016_v41, %v2015_v38  ;;  %v2017_v48 = vld [vmem:[#allocation2 + $0x17] sm:$0xff]  ;;  %v2018_v49 = vld [vmem:[#allocation2 + $0x1f] sm:$0xff]  ;;  %v2276_v6 = vld [vmem:[#allocation2 + $0x9] sm:$0xff] }
 0x3c4   :  { %v2022_v53 = vpack.c.bf16 %v2018_v49, %v2017_v48  ;;  %v2019_v55 = vld [vmem:[#allocation2 + $0x27] sm:$0xff]  ;;  %v2020_v57 = vld [vmem:[#allocation2 + $0x2f] sm:$0xff]  ;;  %v2278_v12 = vld [vmem:[#allocation2 + $0x19] sm:$0xff] }
 0x3c5   :  { %3619 = vmatmul.mubr.bf16.gmra.mrb[16].mxu1 %v2047_v24  ;;  %v2023_v63 = vpack.c.bf16 %v2020_v57, %v2019_v55  ;;  %v2277_v7 = vld [vmem:[#allocation2 + $0x11] sm:$0xff]  ;;  %v2279_v13 = vld [vmem:[#allocation2 + $0x21] sm:$0xff]  ;;  %v2280_v39 = vld [vmem:[#allocation2 + $0x29] sm:$0xff] }
 0x3c6   :  { %3631 = vmatpush3.bf16.msra.mxu1 %v4009_v0  ;;  %3622 = vmatprep.mubr.msk.bf16.mxu1 %vm4042_vm0, %v4973_v29  ;;  %v2282_v9 = vpack.c.bf16 %v2277_v7, %v2276_v6  ;;  %v2283_v35 = vpack.c.bf16 %v2279_v13, %v2278_v12  ;;  %v2281_v47 = vld [vmem:[#allocation2 + $0x31] sm:$0xff] }
 0x3c7   :  { %3632 = vmatprep.subr.bf16.mxu1 %v4973_v29  ;;  %v2284_v3 = vpack.c.bf16 %v2281_v47, %v2280_v39 }
 0x3ca   :  { %3633 = vmatpush3.bf16.msra.mxu1 %v4010_v62 }
 0x3cb   :  { %3634 = vmatprep.subr.bf16.mxu1 %v4973_v29 }
 0x3cd   :  { %3623 = vmatmul.mubr.bf16.gmra.mrb[20].mxu1 %v2048_v25 }
 0x3ce   :  { %3635 = vmatpush3.bf16.msra.mxu1 %v4011_v30  ;;  %3642 = vmatprep.mubr.msk.bf16.mxu1 %vm4042_vm0, %v4973_v29 }
 0x3cf   :  { %3636 = vmatprep.subr.bf16.mxu1 %v4973_v29 }
 0x3d2   :  { %3637 = vmatpush3.bf16.msra.mxu1 %v4012_v31 }
 0x3d3   :  { %3638 = vmatprep.subr.bf16.mxu1 %v4973_v29 }
 0x3d6   :  { %3639 = vmatpush3.bf16.msra.mxu1 %v4013_v32 }
 0x3d7   :  { %3640 = vmatprep.subr.bf16.mxu1 %v4973_v29 }
 0x3da   :  { %3641 = vmatpush3.bf16.msra.mxu1 %v4014_v37 }
 0x3db   :  { %3654 = vmatprep.subr.bf16.mxu1 %v4973_v29 }
 0x3dd   :  { %3643 = vmatmul.mubr.bf16.vlgmr.msra.gmra.mrb[12].mxu1 %v2021_v44 }
 0x3de   :  { %3655 = vmatpush3.bf16.msra.mxu1 %v4015_v43  ;;  %3646 = vmatprep.mubr.msk.bf16.mxu1 %vm4042_vm0, %v4973_v29 }
 0x3df   :  { %3656 = vmatprep.subr.bf16.mxu1 %v4973_v29 }
 0x3e2   :  { %3657 = vmatpush3.bf16.msra.mxu1 %v4016_v45 }
 0x3e3   :  { %3658 = vmatprep.subr.bf16.mxu1 %v4973_v29 }
 0x3e5   :  { %3647 = vmatmul.mubr.bf16.gmra.mrb[16].mxu1 %v2022_v53 }
 0x3e6   :  { %3659 = vmatpush3.bf16.msra.mxu1 %v4017_v52  ;;  %3650 = vmatprep.mubr.msk.bf16.mxu1 %vm4042_vm0, %v4973_v29 }
 0x3e7   :  { %3660 = vmatprep.subr.bf16.mxu1 %v4973_v29 }
 0x3ea   :  { %3661 = vmatpush3.bf16.msra.mxu1 %v4018_v54 }
 0x3eb   :  { %3662 = vmatprep.subr.bf16.mxu1 %v4973_v29 }
 0x3ed   :  { %3651 = vmatmul.mubr.bf16.gmra.mrb[20].mxu1 %v2023_v63 }
 0x3ee   :  { %3663 = vmatpush3.bf16.msra.mxu1 %v4019_v58  ;;  %3670 = vmatprep.mubr.msk.bf16.mxu1 %vm4042_vm0, %v4973_v29 }
 0x3ef   :  { %3664 = vmatprep.subr.bf16.mxu1 %v4973_v29 }
 0x3f2   :  { %3665 = vmatpush3.bf16.msra.mxu1 %v4020_v1 }
 0x3f3   :  { %3666 = vmatprep.subr.bf16.mxu1 %v4973_v29 }
 0x3f6   :  { %3667 = vmatpush3.bf16.msra.mxu1 %v4021_v4 }
 0x3f7   :  { %3668 = vmatprep.subr.bf16.mxu1 %v4973_v29 }
 0x3fa   :  { %3669 = vmatpush3.bf16.msra.mxu1 %v4022_v5 }
 0x3fb   :  { %3710 = vmatprep.subr.bf16.mxu1 %v4973_v29 }
 0x3fd   :  { %3671 = vmatmul.mubr.bf16.vlgmr.msra.gmra.mrb[12].mxu1 %v2282_v9 }
 0x3fe   :  { %3718 = vmatpush3.bf16.msra.mxu1 %v4033_v10  ;;  %3674 = vmatprep.mubr.msk.bf16.mxu1 %vm4042_vm0, %v4973_v29 }
 0x3ff   :  { %3711 = vmatprep.subr.bf16.mxu1 %v4973_v29 }
 0x402   :  { %3719 = vmatpush3.bf16.msra.mxu1 %v4034_v28 }
 0x403   :  { %3712 = vmatprep.subr.bf16.mxu1 %v4973_v29 }
 0x405   :  { %3675 = vmatmul.mubr.bf16.gmra.mrb[16].mxu1 %v2283_v35 }
 0x406   :  { %3720 = vmatpush3.bf16.msra.mxu1 %v4035_v14  ;;  %3678 = vmatprep.mubr.msk.bf16.mxu1 %vm4042_vm0, %v4973_v29 }
 0x407   :  { %3713 = vmatprep.subr.bf16.mxu1 %v4973_v29 }
 0x40a   :  { %3721 = vmatpush3.bf16.msra.mxu1 %v4036_v51 }
 0x40b   :  { %3714 = vmatprep.subr.bf16.mxu1 %v4973_v29 }
 0x40d   :  { %3679 = vmatmul.mubr.bf16.gmra.mrb[20].mxu1 %v2284_v3 }
 0x40e   :  { %3722 = vmatpush3.bf16.msra.mxu1 %v4037_v15  ;;  %3702 = vmatprep.mubr.msk.bf16.mxu1 %vm4042_vm0, %v4973_v29 }
 0x40f   :  { %3715 = vmatprep.subr.bf16.mxu1 %v4973_v29 }
 0x412   :  { %3723 = vmatpush3.bf16.msra.mxu1 %v4038_v17 }
 0x413   :  { %3716 = vmatprep.subr.bf16.mxu1 %v4973_v29 }
 0x416   :  { %3724 = vmatpush3.bf16.msra.mxu1 %v4039_v18 }
 0x417   :  { %3717 = vmatprep.subr.bf16.mxu1 %v4973_v29 }
 0x41a   :  { %3725 = vmatpush3.bf16.msra.mxu1 %v4040_v59 }
 0x41d   :  { %3703 = vmatmul.mubr.bf16.vlgmr.msra.gmra.mrb[24].mxu1 %v2495_v56 }
 0x41e   :  { %3706 = vmatprep.mubr.msk.bf16.mxu1 %vm4042_vm0, %v4973_v29 }
 0x425   :  { %3707 = vmatmul.mubr.bf16.gmra.mrb[28].mxu1 %v2496_v61 }
 0x4d0   :  { %v5096_v16 = vpop.f32.mrb[12].mxu1 }
 0x4d1   :  { %v2413_v22 = vmul.f32 %v5096_v16, %v4662_v34  ;;  %v3672_v23 = vpop.f32.mrb[13].mxu1 }
 0x4d2   :  { %v5100_v24 = vpop.f32.mrb[14].mxu1 }
 0x4d3   :  { %v2414_v25 = vmul.f32 %v5100_v24, %v4666_v36  ;;  %v3673_v27 = vpop.f32.mrb[15].mxu1  ;;  %v2430_v29 = vmul.f32 %v2413_v22, %v2413_v22 }
 0x4d5   :  { %v2419_v0 = vadd.f32 %v2414_v25, %v2413_v22  ;;  %v2431_v62 = vmul.f32 %v2414_v25, %v2414_v25 }
 0x4d7   :  { %v2436_v30 = vadd.f32 %v2431_v62, %v2430_v29 }
 0x4d8   :  { %v5104_v31 = vpop.f32.mrb[16].mxu1 }
 0x4d9   :  { %v2415_v32 = vmul.f32 %v5104_v31, %v4674_v42  ;;  %v3676_v37 = vpop.f32.mrb[17].mxu1 }
 0x4da   :  { %v5108_v38 = vpop.f32.mrb[18].mxu1 }
 0x4db   :  { %v2420_v34 = vadd.f32 %v2419_v0, %v2415_v32  ;;  %v2432_v41 = vmul.f32 %v2415_v32, %v2415_v32  ;;  %v2416_v43 = vmul.f32 %v5108_v38, %v4680_v50  ;;  %v3677_v44 = vpop.f32.mrb[19].mxu1 }
 0x4dd   :  { %v2437_v36 = vadd.f32 %v2436_v30, %v2432_v41  ;;  %v2421_v45 = vadd.f32 %v2420_v34, %v2416_v43  ;;  %v2433_v48 = vmul.f32 %v2416_v43, %v2416_v43 }
 0x4df   :  { %v2438_v49 = vadd.f32 %v2437_v36, %v2433_v48 }
 0x4e0   :  { %v5112_v52 = vpop.f32.mrb[20].mxu1 }
 0x4e1   :  { %v2417_v53 = vmul.f32 %v5112_v52, %v4686_v60  ;;  %v3680_v54 = vpop.f32.mrb[21].mxu1 }
 0x4e2   :  { %v5116_v55 = vpop.f32.mrb[22].mxu1 }
 0x4e3   :  { %v2422_v57 = vadd.f32 %v2421_v45, %v2417_v53  ;;  %v2434_v58 = vmul.f32 %v2417_v53, %v2417_v53  ;;  %v2418_v63 = vmul.f32 %v5116_v55, %v4689_v2  ;;  %v3681_v1 = vpop.f32.mrb[23].mxu1 }
 0x4e5   :  { %v2439_v4 = vadd.f32 %v2438_v49, %v2434_v58  ;;  %v2423_v5 = vadd.f32 %v2422_v57, %v2418_v63  ;;  %v2435_v6 = vmul.f32 %v2418_v63, %v2418_v63 }
 0x4e7   :  { %v2424_v7 = vrot.slane %v2423_v5, 4  ;;  %v2440_v9 = vadd.f32 %v2439_v4, %v2435_v6 }
 0x4e9   :  { %v2425_v10 = vadd.f32 %v2424_v7, %v2423_v5  ;;  %v2441_v12 = vrot.slane %v2440_v9, 4 }
 0x4eb   :  { %v2426_v13 = vrot.slane %v2425_v10, 2  ;;  %v2442_v28 = vadd.f32 %v2441_v12, %v2440_v9 }
 0x4ed   :  { %v2427_v35 = vadd.f32 %v2426_v13, %v2425_v10  ;;  %v2443_v14 = vrot.slane %v2442_v28, 2 }
 0x4ef   :  { %v2428_v39 = vrot.slane %v2427_v35, 1  ;;  %v2444_v47 = vadd.f32 %v2443_v14, %v2442_v28 }
 0x4f0   :  { %v5120_v51 = vpop.f32.mrb[24].mxu1 }
 0x4f1   :  { %v2429_v3 = vadd.f32 %v2428_v39, %v2427_v35  ;;  %v2445_v15 = vrot.slane %v2444_v47, 1  ;;  %v2620_v17 = vmul.f32 %v5120_v51, %v4674_v42  ;;  %v3704_v18 = vpop.f32.mrb[25].mxu1 }
 0x4f2   :  { %v5124_v19 = vpop.f32.mrb[26].mxu1 }
 0x4f3   :  { %v2446_v20 = vadd.f32 %v2445_v15, %v2444_v47  ;;  %v2447_v56 = vmul.f32 0.03125, %v2429_v3  ;;  %v2625_v59 = vadd.f32 %v4700_v33, %v2620_v17  ;;  %v2637_v8 = vmul.f32 %v2620_v17, %v2620_v17  ;;  %v3705_v11 = vpop.f32.mrb[27].mxu1 }
 0x4f4   :  { %v2621_v61 = vmul.f32 %v5124_v19, %v4680_v50 }
 0x4f5   :  { %v2448_v22 = vmul.f32 0.03125, %v2446_v20  ;;  %v2449_v23 = vmul.f32 %v2447_v56, %v2447_v56  ;;  %v2642_v25 = vadd.f32 %v4702_v40, %v2637_v8 }
 0x4f6   :  { %v2626_v27 = vadd.f32 %v2625_v59, %v2621_v61  ;;  %v2638_v29 = vmul.f32 %v2621_v61, %v2621_v61 }
 0x4f7   :  { %v2450_v0 = vsub.f32 %v2448_v22, %v2449_v23  ;;  %v2660_v23 = vld [vmem:[%s5197_s13] sm:$0x1] }
 0x4f8   :  { %v2643_v42 = vadd.f32 %v2642_v25, %v2638_v29  ;;  %v5130_v62 = vpop.f32.mrb[28].mxu1 }
 0x4f9   :  { %v2452_v30 = vadd.f32 1e-05, %v2450_v0  ;;  %v2622_v32 = vmul.f32 %v5130_v62, %v4686_v60  ;;  %v3708_v33 = vpop.f32.mrb[29].mxu1  ;;  %v2451_v60 = vld [vmem:[%s5194_s9] sm:$0x1] }
 0x4fa   :  { %v5134_v37 = vpop.f32.mrb[30].mxu1 }
 0x4fb   :  { %4027 = vrsqrt.f32 %v2452_v30  ;;  %v2627_v34 = vadd.f32 %v2626_v27, %v2622_v32  ;;  %v2639_v50 = vmul.f32 %v2622_v32, %v2622_v32  ;;  %v2623_v41 = vmul.f32 %v5134_v37, %v4689_v2  ;;  %v3709_v40 = vpop.f32.mrb[31].mxu1  ;;  %v2455_v2 = vld [vmem:[%s5195_s10] sm:$0x1] }
 0x4fd   :  { %v2644_v43 = vadd.f32 %v2643_v42, %v2639_v50  ;;  %v2628_v44 = vadd.f32 %v2627_v34, %v2623_v41  ;;  %v2640_v36 = vmul.f32 %v2623_v41, %v2623_v41 }
 0x4ff   :  { %v2629_v45 = vrot.slane %v2628_v44, 4  ;;  %v2645_v48 = vadd.f32 %v2644_v43, %v2640_v36 }
 0x501   :  { %v2630_v49 = vadd.f32 %v2629_v45, %v2628_v44  ;;  %v2646_v53 = vrot.slane %v2645_v48, 4 }
 0x503   :  { %v2631_v54 = vrot.slane %v2630_v49, 2  ;;  %v2647_v57 = vadd.f32 %v2646_v53, %v2645_v48 }
 0x505   :  { %v4028_v58 = vpop.eup %4027  ;;  %v2632_v63 = vadd.f32 %v2631_v54, %v2630_v49  ;;  %v2648_v1 = vrot.slane %v2647_v57, 2 }
 0x506   :  { %v2454_v4 = vmul.f32 %v4028_v58, %v2451_v60 }
 0x507   :  { %v2633_v5 = vrot.slane %v2632_v63, 1  ;;  %v2649_v6 = vadd.f32 %v2648_v1, %v2647_v57 }
 0x508   :  { %v2456_v7 = vmul.f32 %v2454_v4, %v2447_v56  ;;  %v2462_v9 = vrot.slane %v2454_v4, %v4707_v46 }
 0x509   :  { %v2634_v10 = vadd.f32 %v2633_v5, %v2632_v63  ;;  %v2650_v12 = vrot.slane %v2649_v6, 1 }
 0x50a   :  { %v2457_v13 = vsub.f32 %v2455_v2, %v2456_v7  ;;  %v2469_v28 = vmul.f32 %v2462_v9, %v5116_v55  ;;  %v2464_v35 = vmul.f32 %v2462_v9, %v5096_v16  ;;  %v2465_v14 = vmul.f32 %v2462_v9, %v5100_v24 }
 0x50b   :  { %v2466_v39 = vmul.f32 %v2462_v9, %v5104_v31  ;;  %v2467_v47 = vmul.f32 %v2462_v9, %v5108_v38  ;;  %v2468_v3 = vmul.f32 %v2462_v9, %v5112_v52  ;;  %v2651_v15 = vadd.f32 %v2650_v12, %v2649_v6  ;;  %v2656_v31 = vld [vmem:[%s5196_s12] sm:$0x1] }
 0x50c   :  { %v2474_v17 = vrot.slane %v2457_v13, %v4707_v46  ;;  %v2652_v18 = vmul.f32 0.03125, %v2634_v10 }
 0x50d   :  { %v2653_v20 = vmul.f32 0.03125, %v2651_v15 }
 0x50e   :  { %v2481_v56 = vadd.f32 %v2474_v17, %v2469_v28  ;;  %v2476_v59 = vadd.f32 %v2474_v17, %v2464_v35  ;;  %v2477_v8 = vadd.f32 %v2474_v17, %v2465_v14  ;;  %v2478_v11 = vadd.f32 %v2474_v17, %v2466_v39 }
 0x50f   :  { %v2479_v55 = vadd.f32 %v2474_v17, %v2467_v47  ;;  %v2480_v61 = vadd.f32 %v2474_v17, %v2468_v3  ;;  %v2654_v16 = vmul.f32 %v2652_v18, %v2652_v18 }
 0x510   :  { %v2482_v41 = vmax.f32 %v2476_v59, 0.0  ;;  %v2483_v40 = vmax.f32 %v2477_v8, 0.0  ;;  %v2484_v43 = vmax.f32 %v2478_v11, 0.0  ;;  %v2487_v49 = vmax.f32 %v2481_v56, 0.0 }
 0x511   :  { %v2655_v22 = vsub.f32 %v2653_v20, %v2654_v16  ;;  %v2485_v44 = vmax.f32 %v2479_v55, 0.0 }
 0x513   :  { %v2657_v24 = vadd.f32 1e-05, %v2655_v22 }
 0x515   :  { %4029 = vrsqrt.f32 %v2657_v24 }
 0x51f   :  { %v4030_v38 = vpop.eup %4029 }
 0x520   :  { %v2659_v52 = vmul.f32 %v4030_v38, %v2656_v31 }
 0x522   :  { %v2661_v25 = vmul.f32 %v2659_v52, %v2652_v18  ;;  %v2667_v27 = vrot.slane %v2659_v52, %v4707_v46 }
 0x524   :  { %v2662_v29 = vsub.f32 %v2660_v23, %v2661_v25  ;;  %v2669_v0 = vmul.f32 %v2667_v27, %v4692_v21  ;;  %v2670_v42 = vmul.f32 %v2667_v27, %v4696_v26  ;;  %v2671_v30 = vmul.f32 %v2667_v27, %v5120_v51 }
 0x525   :  { %v2672_v32 = vmul.f32 %v2667_v27, %v5124_v19  ;;  %v2673_v33 = vmul.f32 %v2667_v27, %v5130_v62  ;;  %v2674_v34 = vmul.f32 %v2667_v27, %v5134_v37  ;;  %v2486_v26 = vmax.f32 %v2480_v61, 0.0 }
 0x526   :  { %v2679_v50 = vrot.slane %v2662_v29, %v4707_v46 }
 0x528   :  { %v2681_v36 = vadd.f32 %v2679_v50, %v2669_v0  ;;  %v2682_v45 = vadd.f32 %v2679_v50, %v2670_v42  ;;  %v2683_v48 = vadd.f32 %v2679_v50, %v2671_v30  ;;  %v2684_v21 = vadd.f32 %v2679_v50, %v2672_v32 }
 0x529   :  { %v2685_v53 = vadd.f32 %v2679_v50, %v2673_v33  ;;  %v2686_v51 = vadd.f32 %v2679_v50, %v2674_v34 }
 0x52a   :  { %v2687_v60 = vadd.f32 %v2681_v36, %v2482_v41  ;;  %v2688_v19 = vadd.f32 %v2682_v45, %v2483_v40  ;;  %v2689_v54 = vadd.f32 %v2683_v48, %v2484_v43  ;;  %v2690_v62 = vadd.f32 %v2684_v21, %v2485_v44 }
 0x52b   :  { %v2691_v57 = vadd.f32 %v2685_v53, %v2486_v26  ;;  %v2692_v37 = vadd.f32 %v2686_v51, %v2487_v49 }
 0x52c   :  { %2693 = vst [vmem:[%s5198_s14] sm:$0xff] %v2687_v60  ;;  %2694 = vst [vmem:[%s5198_s14 + $0x8] sm:$0xff] %v2688_v19 }
 0x52d   :  { %2695 = vst [vmem:[%s5198_s14 + $0x10] sm:$0xff] %v2689_v54  ;;  %2696 = vst [vmem:[%s5198_s14 + $0x18] sm:$0xff] %v2690_v62 }
 0x52e   :  { %2697 = vst [vmem:[%s5198_s14 + $0x20] sm:$0xff] %v2691_v57  ;;  %2698 = vst [vmem:[%s5198_s14 + $0x28] sm:$0xff] %v2692_v37 }

</bundles_post_ra>
